<compile_context>
chip_gen: v7x
topology: tpu7x:2x2x1
jax: 0.10.0
libtpu: 0.0.40
codegen_flags: <defaults>
</compile_context>

<pallas_src>
import math
import functools

import jax
import jax.numpy as jnp
from jax.experimental import pallas as pl
from jax.experimental.pallas import tpu as pltpu


# --------------------------------------------------------------------------
# Kernel body
# --------------------------------------------------------------------------
def _cpm_ffn_block_kernel(h_ref, r_ref, ln_w_ref, wg_ref, wu_ref, wo_ref,
                          out_ref, resid_ref, h_sc, acc_sc,
                          *, eps, depth_scale):
    j = pl.program_id(1)  # intermediate-dim (reduction) tile index

    # First I-tile for this token tile: residual add + RMSNorm (f32 variance,
    # cast back to activation dtype like torch), cached in VMEM scratch.
    @pl.when(j == 0)
    def _():
        x = h_ref[...].astype(jnp.float32)
        r = r_ref[...].astype(jnp.float32)
        residual = x + r
        resid_ref[...] = residual.astype(resid_ref.dtype)
        var = jnp.mean(residual * residual, axis=-1, keepdims=True)
        normed = (residual * jax.lax.rsqrt(var + eps)).astype(h_sc.dtype)
        h_sc[...] = normed * ln_w_ref[...].astype(h_sc.dtype)

    # Per-I-tile fused gate/up projection, SiluAndMul, and down projection.
    # Matmul operands stay in native (e.g. bf16) dtype; accumulate in f32.
    h = h_sc[...]
    gate = jnp.dot(h, wg_ref[...], preferred_element_type=jnp.float32)
    up = jnp.dot(h, wu_ref[...], preferred_element_type=jnp.float32)
    act = gate * jax.nn.sigmoid(gate) * up
    part = jnp.dot(act.astype(wo_ref.dtype), wo_ref[...],
                   preferred_element_type=jnp.float32)

    # Init with first product (saves a full (tm,H) f32 zero-store + reload).
    @pl.when(j == 0)
    def _():
        acc_sc[...] = part

    @pl.when(j > 0)
    def _():
        acc_sc[...] += part

    # Last I-tile: apply depth scaling once and write the finished tile.
    @pl.when(j == pl.num_programs(1) - 1)
    def _():
        acc = acc_sc[...]
        if depth_scale != 1.0:
            acc = acc * depth_scale
        out_ref[...] = acc.astype(out_ref.dtype)


# --------------------------------------------------------------------------
# Tile selection / VMEM budgeting
# --------------------------------------------------------------------------
def _footprint_bytes(tm, tn, H, act_bytes, w_bytes):
    """Per-step VMEM footprint for this kernel's BlockSpecs."""
    weights = 2 * 3 * H * tn * w_bytes          # gate + up + out tiles, 2x-buffered
    acts_io = 2 * 4 * tm * H * act_bytes        # 2 inputs + 2 outputs, 2x-buffered
    scratch = tm * H * act_bytes + tm * H * 4   # h_sc + f32 accumulator
    ln = 2 * H * act_bytes                      # layernorm weight (tiny)
    return weights + acts_io + scratch + ln


def _select_tiles(T, H, inter, act_bytes, w_bytes, budget):
    tn_cands = [c for c in (512, 256, 128) if c <= inter and inter % c == 0]
    if not tn_cands:
        tn_cands = [inter]
    tm_cands = [c for c in (1024, 512, 256, 128, 64, 32, 16, 8)
                if c <= T and T % c == 0]
    if not tm_cands:
        tm_cands = [T]  # full-dim block is always legal (non-8-multiple T)
    # Prefer >= 2 token tiles so megacore (v7x) can shard the "parallel" axis.
    multi = [c for c in tm_cands if T // c >= 2]
    if multi:
        tm_cands = multi

    # Pick tn first: largest whose double-buffered weight tiles fit half budget.
    tn = tn_cands[-1]
    for c in tn_cands:
        if 2 * 3 * H * c * w_bytes <= budget // 2:
            tn = c
            break
    # Then the largest tm whose total footprint fits the budget.
    tm = tm_cands[-1]
    for c in tm_cands:
        if _footprint_bytes(c, tn, H, act_bytes, w_bytes) <= budget:
            tm = c
            break
    return tm, tn


# --------------------------------------------------------------------------
# Wrapper
# --------------------------------------------------------------------------
def cpm_ffn_block(hidden_states, residual, ln_weight, w_gate_up, w_out,
                  *, eps, scale_depth, num_layers, tm=None, tn=None):
    """hidden_states, residual: [T, H]; ln_weight: [H];
       w_gate_up: [H, 2*I] (gate cols then up cols); w_out: [I, H].
       Returns (out [T, H], residual_out [T, H])."""
    T, H = hidden_states.shape
    two_i = w_gate_up.shape[1]
    inter = two_i // 2
    assert w_out.shape == (inter, H)
    depth_scale = (scale_depth / math.sqrt(num_layers)) if scale_depth > 0 else 1.0

    act_bytes = jnp.dtype(hidden_states.dtype).itemsize
    w_bytes = jnp.dtype(w_gate_up.dtype).itemsize

    # VMEM capacity per TensorCore (128 MiB v5e/v6e, 64 MiB v7x); keep headroom
    # for compiler internal scratch.
    try:
        vmem_cap = int(pltpu.get_tpu_info().vmem_capacity_bytes)
    except Exception:
        vmem_cap = 64 << 20  # conservative (v7x)
    budget = int(0.75 * vmem_cap)

    auto_tm, auto_tn = _select_tiles(T, H, inter, act_bytes, w_bytes, budget)
    if tm is None:
        tm = auto_tm
    if tn is None:
        tn = auto_tn

    footprint = _footprint_bytes(tm, tn, H, act_bytes, w_bytes)
    vmem_limit = int(min(int(0.96 * vmem_cap),
                         max(32 << 20, int(footprint * 1.25) + (8 << 20))))

    grid = (T // tm, inter // tn)
    n_j = inter // tn  # number of intermediate tiles (up half starts here)

    kernel = functools.partial(_cpm_ffn_block_kernel, eps=eps,
                               depth_scale=depth_scale)

    out_shapes = (
        jax.ShapeDtypeStruct((T, H), hidden_states.dtype),
        jax.ShapeDtypeStruct((T, H), hidden_states.dtype),
    )

    return pl.pallas_call(
        kernel,
        out_shape=out_shapes,
        grid_spec=pltpu.PrefetchScalarGridSpec(
            num_scalar_prefetch=0,
            grid=grid,
            in_specs=[
                pl.BlockSpec((tm, H), lambda i, j: (i, 0)),          # hidden_states
                pl.BlockSpec((tm, H), lambda i, j: (i, 0)),          # residual
                pl.BlockSpec((1, H), lambda i, j: (0, 0)),           # ln weight
                # Merged gate/up weight addressed twice (no wrapper-side slice
                # => no per-call full-weight HBM copies):
                pl.BlockSpec((H, tn), lambda i, j: (0, j)),          # gate half
                pl.BlockSpec((H, tn), lambda i, j: (0, j + n_j)),    # up half
                pl.BlockSpec((tn, H), lambda i, j: (j, 0)),          # W_out tile
            ],
            out_specs=[
                pl.BlockSpec((tm, H), lambda i, j: (i, 0)),          # out
                pl.BlockSpec((tm, H), lambda i, j: (i, 0)),          # residual_out
            ],
            scratch_shapes=[
                pltpu.VMEM((tm, H), hidden_states.dtype),            # normed hidden
                pltpu.VMEM((tm, H), jnp.float32),                    # f32 accumulator
            ],
        ),
        compiler_params=pltpu.CompilerParams(
            dimension_semantics=("parallel", "arbitrary"),
            vmem_limit_bytes=vmem_limit),
    )(hidden_states, residual, ln_weight.reshape(1, H),
      w_gate_up, w_gate_up, w_out)


# --------------------------------------------------------------------------
# Pure-JAX reference
# --------------------------------------------------------------------------
def _reference(hidden_states, residual, ln_weight, w_gate_up, w_out,
               *, eps, scale_depth, num_layers):
    hidden_states = hidden_states.astype(jnp.float32)
    residual = hidden_states + residual.astype(jnp.float32)
    var = jnp.mean(residual ** 2, axis=-1, keepdims=True)
    h = residual * jax.lax.rsqrt(var + eps) * ln_weight.astype(jnp.float32)
    gate_up = h @ w_gate_up.astype(jnp.float32)
    inter = w_gate_up.shape[1] // 2
    gate, up = gate_up[:, :inter], gate_up[:, inter:]
    act = gate * jax.nn.sigmoid(gate) * up
    out = act @ w_out.astype(jnp.float32)
    if scale_depth > 0:
        out = scale_depth / math.sqrt(num_layers) * out
    return out, residual


if __name__ == "__main__":
    # Small config consistent with the module's __init__.
    T = 128            # num tokens (batch * seq)
    H = 256            # hidden_size
    I = 512            # intermediate_size
    EPS = 1e-6
    SCALE_DEPTH = 1.4
    NUM_LAYERS = 8

    key = jax.random.PRNGKey(0)
    k0, k1, k2, k3, k4 = jax.random.split(key, 5)

    hidden_states = jax.random.normal(k0, (T, H), dtype=jnp.float32)
    residual = jax.random.normal(k1, (T, H), dtype=jnp.float32)
    ln_weight = 1.0 + 0.1 * jax.random.normal(k4, (H,), dtype=jnp.float32)
    # torch init shapes: Wgu [2I, H], Wout [H, I] -> transpose for right-mul.
    w_gate_up = (jax.random.normal(k2, (2 * I, H), dtype=jnp.float32) * 0.02).T  # [H, 2I]
    w_out = (jax.random.normal(k3, (H, I), dtype=jnp.float32) * 0.02).T          # [I, H]

    # --- f32 correctness check (tight tolerance) ---
    out, resid = cpm_ffn_block(hidden_states, residual, ln_weight, w_gate_up, w_out,
                               eps=EPS, scale_depth=SCALE_DEPTH, num_layers=NUM_LAYERS)
    out = jax.block_until_ready(out)
    resid = jax.block_until_ready(resid)

    ref_out, ref_resid = _reference(hidden_states, residual, ln_weight, w_gate_up,
                                    w_out, eps=EPS, scale_depth=SCALE_DEPTH,
                                    num_layers=NUM_LAYERS)
    assert jnp.allclose(out, ref_out, atol=1e-4, rtol=1e-4), "f32 output mismatch"
    assert jnp.allclose(resid, ref_resid, atol=1e-5, rtol=1e-5), "f32 residual mismatch"

    # --- bf16 smoke test: exercises the native-dtype (bf16 MXU) fast path ---
    out_bf, resid_bf = cpm_ffn_block(
        hidden_states.astype(jnp.bfloat16), residual.astype(jnp.bfloat16),
        ln_weight.astype(jnp.bfloat16), w_gate_up.astype(jnp.bfloat16),
        w_out.astype(jnp.bfloat16),
        eps=EPS, scale_depth=SCALE_DEPTH, num_layers=NUM_LAYERS)
    out_bf = jax.block_until_ready(out_bf)
    resid_bf = jax.block_until_ready(resid_bf)
    assert bool(jnp.all(jnp.isfinite(out_bf.astype(jnp.float32))))
    scale = float(jnp.max(jnp.abs(ref_out))) + 1e-6
    assert float(jnp.max(jnp.abs(out_bf.astype(jnp.float32) - ref_out))) < 0.05 * scale, \
        "bf16 output deviates too much from f32 reference"

    # TODO(synk): RowParallelLinear's tensor-parallel all-reduce / sharded
    # weight loading and the quantized `linear_method` hooks are distributed /
    # framework concerns outside a single-chip kernel.

    print("KERNEL_OK")
</pallas_src>

<mosaic_0001>
module attributes {stable_mosaic.version = 11 : i64} {
  func.func @_cpm_ffn_block_kernel(%arg0: i32, %arg1: i32, %arg2: memref<64x256xf32, #tpu.memory_space<vmem>>, %arg3: memref<64x256xf32, #tpu.memory_space<vmem>>, %arg4: memref<1x256xf32, #tpu.memory_space<vmem>>, %arg5: memref<256x512xf32, #tpu.memory_space<vmem>>, %arg6: memref<256x512xf32, #tpu.memory_space<vmem>>, %arg7: memref<512x256xf32, #tpu.memory_space<vmem>>, %arg8: memref<64x256xf32, #tpu.memory_space<vmem>>, %arg9: memref<64x256xf32, #tpu.memory_space<vmem>>, %arg10: memref<64x256xf32, #tpu.memory_space<vmem>>, %arg11: memref<64x256xf32, #tpu.memory_space<vmem>>) attributes {dimension_semantics = [#tpu.dimension_semantics<parallel>, #tpu.dimension_semantics<arbitrary>], iteration_bounds = array<i64: 2, 1>, scalar_prefetch = 0 : i64, scratch_operands = 2 : i64, tpu.core_type = #tpu.core_type<tc>, window_params = [{transform_indices = @transform_0, window_bounds = array<i64: 64, 256>}, {transform_indices = @transform_1, window_bounds = array<i64: 64, 256>}, {pipeline_mode = #tpu.pipeline_mode<synchronous>, transform_indices = @transform_2, window_bounds = array<i64: 1, 256>}, {transform_indices = @transform_3, window_bounds = array<i64: 256, 512>}, {transform_indices = @transform_4, window_bounds = array<i64: 256, 512>}, {transform_indices = @transform_5, window_bounds = array<i64: 512, 256>}, {transform_indices = @transform_6, window_bounds = array<i64: 64, 256>}, {transform_indices = @transform_7, window_bounds = array<i64: 64, 256>}]} {
    %c0_i32 = arith.constant 0 : i32
    %0 = arith.cmpi eq, %arg1, %c0_i32 : i32
    %1 = arith.extui %0 : i1 to i32
    %c0_i32_0 = arith.constant 0 : i32
    %2 = arith.cmpi ne, %1, %c0_i32_0 : i32
    scf.if %2 {
      %c0_17 = arith.constant 0 : index
      %c0_18 = arith.constant 0 : index
      %26 = vector.load %arg2[%c0_17, %c0_18] : memref<64x256xf32, #tpu.memory_space<vmem>>, vector<64x256xf32>
      %c0_19 = arith.constant 0 : index
      %c0_20 = arith.constant 0 : index
      %27 = vector.load %arg3[%c0_19, %c0_20] : memref<64x256xf32, #tpu.memory_space<vmem>>, vector<64x256xf32>
      %28 = arith.addf %26, %27 : vector<64x256xf32>
      %c0_21 = arith.constant 0 : index
      %c0_22 = arith.constant 0 : index
      %29 = vector.load %arg9[%c0_21, %c0_22] : memref<64x256xf32, #tpu.memory_space<vmem>>, vector<64x256xf32>
      tpu.vector_store %arg9[%c0_21, %c0_22], %28 {strides = array<i32>} : memref<64x256xf32, #tpu.memory_space<vmem>>, vector<64x256xf32>,
      %30 = arith.mulf %28, %28 : vector<64x256xf32>
      %cst_23 = arith.constant dense<0.000000e+00> : vector<64xf32>
      %31 = vector.multi_reduction <add>, %30, %cst_23 [1] : vector<64x256xf32> to vector<64xf32>
      %32 = vector.shape_cast %31 : vector<64xf32> to vector<64x1xf32>
      %cst_24 = arith.constant 2.560000e+02 : f32
      %33 = vector.broadcast %cst_24 : f32 to vector<64x1xf32>
      %34 = arith.divf %32, %33 : vector<64x1xf32>
      %cst_25 = arith.constant 9.99999997E-7 : f32
      %35 = vector.broadcast %cst_25 : f32 to vector<64x1xf32>
      %36 = arith.addf %34, %35 : vector<64x1xf32>
      %37 = math.rsqrt %36 : vector<64x1xf32>
      %38 = vector.broadcast %37 : vector<64x1xf32> to vector<64x256xf32>
      %39 = arith.mulf %28, %38 : vector<64x256xf32>
      %c0_26 = arith.constant 0 : index
      %c0_27 = arith.constant 0 : index
      %40 = vector.load %arg4[%c0_26, %c0_27] : memref<1x256xf32, #tpu.memory_space<vmem>>, vector<1x256xf32>
      %41 = vector.broadcast %40 : vector<1x256xf32> to vector<64x256xf32>
      %42 = arith.mulf %39, %41 : vector<64x256xf32>
      %c0_28 = arith.constant 0 : index
      %c0_29 = arith.constant 0 : index
      %43 = vector.load %arg10[%c0_28, %c0_29] : memref<64x256xf32, #tpu.memory_space<vmem>>, vector<64x256xf32>
      tpu.vector_store %arg10[%c0_28, %c0_29], %42 {strides = array<i32>} : memref<64x256xf32, #tpu.memory_space<vmem>>, vector<64x256xf32>,
    } else {
    }
    %c0 = arith.constant 0 : index
    %c0_1 = arith.constant 0 : index
    %3 = vector.load %arg10[%c0, %c0_1] : memref<64x256xf32, #tpu.memory_space<vmem>>, vector<64x256xf32>
    %c0_2 = arith.constant 0 : index
    %c0_3 = arith.constant 0 : index
    %4 = vector.load %arg5[%c0_2, %c0_3] : memref<256x512xf32, #tpu.memory_space<vmem>>, vector<256x512xf32>
    %cst = arith.constant dense<0.000000e+00> : vector<64x512xf32>
    %5 = tpu.matmul %3, %4, %cst {dimension_numbers = #tpu.dot_dimension_numbers<[1], [0], [0], [1], [0, 0, 1, 1], [], []>} : vector<64x256xf32>, vector<256x512xf32>, vector<64x512xf32> -> vector<64x512xf32>
    %c0_4 = arith.constant 0 : index
    %c0_5 = arith.constant 0 : index
    %6 = vector.load %arg6[%c0_4, %c0_5] : memref<256x512xf32, #tpu.memory_space<vmem>>, vector<256x512xf32>
    %cst_6 = arith.constant dense<0.000000e+00> : vector<64x512xf32>
    %7 = tpu.matmul %3, %6, %cst_6 {dimension_numbers = #tpu.dot_dimension_numbers<[1], [0], [0], [1], [0, 0, 1, 1], [], []>} : vector<64x256xf32>, vector<256x512xf32>, vector<64x512xf32> -> vector<64x512xf32>
    %8 = arith.negf %5 : vector<64x512xf32>
    %9 = math.exp %8 : vector<64x512xf32>
    %cst_7 = arith.constant 1.000000e+00 : f32
    %10 = vector.broadcast %cst_7 : f32 to vector<64x512xf32>
    %11 = arith.addf %10, %9 : vector<64x512xf32>
    %12 = arith.divf %10, %11 : vector<64x512xf32>
    %13 = arith.mulf %5, %12 : vector<64x512xf32>
    %14 = arith.mulf %13, %7 : vector<64x512xf32>
    %c0_8 = arith.constant 0 : index
    %c0_9 = arith.constant 0 : index
    %15 = vector.load %arg7[%c0_8, %c0_9] : memref<512x256xf32, #tpu.memory_space<vmem>>, vector<512x256xf32>
    %cst_10 = arith.constant dense<0.000000e+00> : vector<64x256xf32>
    %16 = tpu.matmul %14, %15, %cst_10 {dimension_numbers = #tpu.dot_dimension_numbers<[1], [0], [0], [1], [0, 0, 1, 1], [], []>} : vector<64x512xf32>, vector<512x256xf32>, vector<64x256xf32> -> vector<64x256xf32>
    %c0_i32_11 = arith.constant 0 : i32
    %17 = arith.cmpi eq, %arg1, %c0_i32_11 : i32
    %18 = arith.extui %17 : i1 to i32
    %c0_i32_12 = arith.constant 0 : i32
    %19 = arith.cmpi ne, %18, %c0_i32_12 : i32
    scf.if %19 {
      %c0_17 = arith.constant 0 : index
      %c0_18 = arith.constant 0 : index
      %26 = vector.load %arg11[%c0_17, %c0_18] : memref<64x256xf32, #tpu.memory_space<vmem>>, vector<64x256xf32>
      tpu.vector_store %arg11[%c0_17, %c0_18], %16 {strides = array<i32>} : memref<64x256xf32, #tpu.memory_space<vmem>>, vector<64x256xf32>,
    } else {
    }
    %c0_i32_13 = arith.constant 0 : i32
    %20 = arith.cmpi sgt, %arg1, %c0_i32_13 : i32
    %21 = arith.extui %20 : i1 to i32
    %c0_i32_14 = arith.constant 0 : i32
    %22 = arith.cmpi ne, %21, %c0_i32_14 : i32
    scf.if %22 {
      %c0_17 = arith.constant 0 : index
      %c0_18 = arith.constant 0 : index
      %26 = vector.load %arg11[%c0_17, %c0_18] : memref<64x256xf32, #tpu.memory_space<vmem>>, vector<64x256xf32>
      %27 = arith.addf %26, %16 : vector<64x256xf32>
      %c0_19 = arith.constant 0 : index
      %c0_20 = arith.constant 0 : index
      %28 = vector.load %arg11[%c0_19, %c0_20] : memref<64x256xf32, #tpu.memory_space<vmem>>, vector<64x256xf32>
      tpu.vector_store %arg11[%c0_19, %c0_20], %27 {strides = array<i32>} : memref<64x256xf32, #tpu.memory_space<vmem>>, vector<64x256xf32>,
    } else {
    }
    %c0_i32_15 = arith.constant 0 : i32
    %23 = arith.cmpi eq, %arg1, %c0_i32_15 : i32
    %24 = arith.extui %23 : i1 to i32
    %c0_i32_16 = arith.constant 0 : i32
    %25 = arith.cmpi ne, %24, %c0_i32_16 : i32
    scf.if %25 {
      %c0_17 = arith.constant 0 : index
      %c0_18 = arith.constant 0 : index
      %26 = vector.load %arg11[%c0_17, %c0_18] : memref<64x256xf32, #tpu.memory_space<vmem>>, vector<64x256xf32>
      %cst_19 = arith.constant 0.494974732 : f32
      %27 = vector.broadcast %cst_19 : f32 to vector<64x256xf32>
      %28 = arith.mulf %26, %27 : vector<64x256xf32>
      %c0_20 = arith.constant 0 : index
      %c0_21 = arith.constant 0 : index
      %29 = vector.load %arg8[%c0_20, %c0_21] : memref<64x256xf32, #tpu.memory_space<vmem>>, vector<64x256xf32>
      tpu.vector_store %arg8[%c0_20, %c0_21], %28 {strides = array<i32>} : memref<64x256xf32, #tpu.memory_space<vmem>>, vector<64x256xf32>,
    } else {
    }
    return
  }
  func.func @transform_0(%arg0: i32, %arg1: i32) -> (i32, i32) {
    %c0_i32 = arith.constant 0 : i32
    %c0_i32_0 = arith.constant 0 : i32
    return %arg0, %c0_i32 : i32, i32
  }
  func.func @transform_1(%arg0: i32, %arg1: i32) -> (i32, i32) {
    %c0_i32 = arith.constant 0 : i32
    %c0_i32_0 = arith.constant 0 : i32
    return %arg0, %c0_i32 : i32, i32
  }
  func.func @transform_2(%arg0: i32, %arg1: i32) -> (i32, i32) {
    %c0_i32 = arith.constant 0 : i32
    %c0_i32_0 = arith.constant 0 : i32
    %c0_i32_1 = arith.constant 0 : i32
    return %c0_i32, %c0_i32_0 : i32, i32
  }
  func.func @transform_3(%arg0: i32, %arg1: i32) -> (i32, i32) {
    %c0_i32 = arith.constant 0 : i32
    %c0_i32_0 = arith.constant 0 : i32
    return %c0_i32, %arg1 : i32, i32
  }
  func.func @transform_4(%arg0: i32, %arg1: i32) -> (i32, i32) {
    %c1_i32 = arith.constant 1 : i32
    %0 = arith.addi %arg1, %c1_i32 : i32
    %c0_i32 = arith.constant 0 : i32
    %c0_i32_0 = arith.constant 0 : i32
    return %c0_i32, %0 : i32, i32
  }
  func.func @transform_5(%arg0: i32, %arg1: i32) -> (i32, i32) {
    %c0_i32 = arith.constant 0 : i32
    %c0_i32_0 = arith.constant 0 : i32
    return %arg1, %c0_i32 : i32, i32
  }
  func.func @transform_6(%arg0: i32, %arg1: i32) -> (i32, i32) {
    %c0_i32 = arith.constant 0 : i32
    %c0_i32_0 = arith.constant 0 : i32
    return %arg0, %c0_i32 : i32, i32
  }
  func.func @transform_7(%arg0: i32, %arg1: i32) -> (i32, i32) {
    %c0_i32 = arith.constant 0 : i32
    %c0_i32_0 = arith.constant 0 : i32
    return %arg0, %c0_i32 : i32, i32
  }
}

</mosaic_0001>

<bundles_post_ra>
// kernel: tpu_custom_call.1
= control target key start
LH: loop header
LB: loop body
LE: loop exit
PB: predicated region body
PF: predicated region fallthrough
CT: control target
= control target key end

     0   :  { %s4198_s0 = inlined_call_operand.hbm [shape: f32[128,256], index: 0, kind: input, shape index: {}]   ;;  %s4199_s1 = inlined_call_operand.hbm [shape: f32[128,256], index: 1, kind: input, shape index: {}]   ;;  %s4200_s2 = inlined_call_operand.vmem [shape: f32[1,256], index: 2, kind: input, shape index: {}]   ;;  %s4201_s3 = inlined_call_operand.hbm [shape: f32[256,1024], index: 3, kind: input, shape index: {}]   ;;  %s4202_s4 = inlined_call_operand.hbm [shape: f32[256,1024], index: 4, kind: input, shape index: {}]   ;;  %s4203_s5 = inlined_call_operand.hbm [shape: f32[512,256], index: 5, kind: input, shape index: {}]   ;;  %s4204_s6 = inlined_call_operand.hbm [shape: f32[128,256], index: 6, kind: output, shape index: {0}]   ;;  %s4205_s7 = inlined_call_operand.hbm [shape: f32[128,256], index: 7, kind: output, shape index: {1}]  }
   0x1   :  { %4218 = sst [smem:[#allocation26_spill]] %s4200_s2 }
   0x2   :  { %4219 = sst [smem:[#allocation27_spill]] %s4204_s6 }
   0x3   :  { %4220 = sst [smem:[#allocation28_spill]] %s4205_s7 }
   0x4   :  { %13 = vsyncpa [#allocation5], 0 }
   0x5   :  { %15 = vsyncpa [#allocation5 + $0x1], 0 }
   0x6   :  { %16 = vsyncpa [#allocation8], 0 }
   0x7   :  { %18 = vsyncpa [#allocation8 + $0x1], 0 }
   0x8   :  { %19 = vsyncpa [#allocation11], 0 }
   0x9   :  { %20 = vsyncpa [#allocation6], 0 }
   0xa   :  { %22 = vsyncpa [#allocation6 + $0x1], 0 }
   0xb   :  { %23 = vsyncpa [#allocation15], 0 }
   0xc   :  { %25 = vsyncpa [#allocation15 + $0x1], 0  ;;  %s3354_s24 = smov 0   ;;  %s3356_s25 = smov 0  }
   0xd   :  { %s3358_s26 = smov 0   ;;  %s3360_s27 = smov 0  }
   0xe   :  { %s3362_s28 = smov 0   ;;  %s3364_s29 = smov 0  }
   0xf LB: > { %4221 = sst [smem:[#allocation22_spill]] %s3278_s24  ;;  %s3385_s30 = sadd.s32 4294967295, %s3298_s29   ;;  %s3298_s29 = sphi %s3364_s29, %s31_s29   ;;  %s3294_s28 = sphi %s3362_s28, %s4254_s28   ;;  %s3290_s27 = sphi %s3360_s27, %s4253_s27   ;;  %s3286_s26 = sphi %s3358_s26, %s4252_s26   ;;  %s3282_s25 = sphi %s3356_s25, %s4251_s25   ;;  %s3278_s24 = sphi %s3354_s24, %s4250_s24  }
  0x10   : > { %4222 = sst [smem:[#allocation23_spill]] %s3290_s27  ;;  %s2299_s8 = sadd.s32 4294967294, %s3298_s29  }
  0x11   : > { %p63_p0 = scmp.ne.s32.totalorder %s3282_s25, %s3278_s24  ;;  %p4206_p1 = scmp.eq.s32.totalorder %s3385_s30, 0 }
  0x12   : > { %p220_p3 = scmp.eq.s32.totalorder %s2299_s8, 1  ;;  %p2300_p5 = scmp.ge.s32.totalorder %s3298_s29, 1 }
  0x13   : > { %p3394_p4 = por %p4206_p1, %p63_p0  ;;  %p253_p7 = scmp.lt.s32.totalorder %s3298_s29, 3 }
  0x14   : > { %p3399_p6 = por %p220_p3, %p63_p0  ;;  %s3300_s12 = smov [#allocation9]  }
  0x15   : > { %s4223_s9 = scalar_select %p3394_p4, 1, 0 }
  0x16   : > { %s4225_s10 = scalar_select %p3399_p6, 1, 0 }
  0x17   : > { %4224 = sst [smem:[#allocation24_spill]] %s4223_s9  ;;  %p3404_p8 = pnand %p2300_p5, %p253_p7 }
  0x18   : > { %4226 = sst [smem:[#allocation25_spill]] %s4225_s10  ;;  %s271_s13 = sshll.u32 %s3300_s12, 4  ;;  %s3408_s13 = int_to_ptr.vmem [resolvable:$true] %s271_s13 }
  0x19   : > { %s4227_s11 = scalar_select %p3404_p8, 1, 0 }
  0x1a   : > { %p2791_p9 = pneg %p3404_p8  ;;  %s3422_s17 = scalar_lea.hbm %s4202_s4, 512 }
  0x1b   : > { %s3301_s18 = smov [#allocation10]   ;;  %s3025_s22 = scalar_lea.hbm %s4201_s3, 16384 }
  0x1c   : > { %p3415_p11 = pnand %p2791_p9, %p4206_p1  ;;  %s288_s19 = sshll.u32 %s3301_s18, 4  ;;  %s289_s19 = int_to_ptr.vmem [resolvable:$true] %s288_s19 }
  0x1d   : > { %p3026_p12 = scmp.ne.s32.totalorder %s4201_s3, %s3025_s22  ;;  %s3030_s18 = scalar_lea.hbm %s4201_s3, 32768 }
  0x1e   : > { %s4228_s14 = scalar_select %p3415_p11, 1, 0 }
  0x1f   : > { %p3432_p13 = pneg %p3415_p11  ;;  %p3031_p5 = scmp.lt.u32.totalorder %s3030_s18, %s3025_s22 }
  0x20   : > { %p3032_p7 = scmp.lt.u32.totalorder %s3025_s22, %s4201_s3 }
  0x21   : > { %p3028_p0 = pnand %p3432_p13, %p3026_p12 }
  0x22   : > { %p3033_p9 = por %p3032_p7, %p3031_p5 }
  0x23   : > { %p3029_p3 = pneg %p3028_p0 }
  0x25   : > { %p3034_p10 = pnand %p3033_p9, %p3029_p3 }
  0x27   : > { %3037 = shalt.err (!%p3034_p10)
}
  0x28   : > { %s3038_s23 = scalar_lea.vmem %s3408_s13, 16384  ;;  %p3046_p2 = scmp.lt.s32.totalorder %s3408_s13, %s3408_s13 }
  0x29   : > { %p3039_p1 = scmp.ne.s32.totalorder %s3408_s13, %s3038_s23  ;;  %p3047_p6 = scmp.lt.s32.totalorder %s3038_s23, %s3038_s23 }
  0x2b   : > { %p3041_p12 = pnand %p3039_p1, %p3432_p13  ;;  %p3048_p4 = por %p3047_p6, %p3046_p2 }
  0x2d   : > { %p3042_p0 = pneg %p3041_p12 }
  0x2f   : > { %p3049_p8 = pnand %p3048_p4, %p3042_p0 }
  0x31   : > { %3052 = shalt.err (!%p3049_p8)
}
  0x32   : > { %s3302_s8 = smov 1024   ;;  %s3303_s22 = smov 512  }
  0x33   : > { %s3304_s15 = smov 32   ;;  %s3305_s20 = smov [#allocation12]  }
  0x34   : > { %2794 = dma.hbm_to_vmem [thread:$0]  (!%p3415_p11), %s4201_s3, 16384, %s3408_s13, [#allocation8], %s3302_s8, %s3303_s22, %s3304_s15  }
  0x35   : > { %s305_s21 = sshll.u32 %s3305_s20, 4  ;;  %s3083_s24 = scalar_lea.hbm %s4202_s4, 16896  ;;  %s306_s21 = int_to_ptr.vmem [resolvable:$true] %s305_s21 }
  0x36   : > { %p3054_p1 = scmp.ne.s32.totalorder %s3422_s17, %s3083_s24  ;;  %s3058_s27 = scalar_lea.hbm %s4202_s4, 32768 }
  0x37   : > { %p3059_p6 = scmp.lt.u32.totalorder %s3422_s17, %s4202_s4  ;;  %p3060_p8 = scmp.lt.u32.totalorder %s3058_s27, %s3083_s24 }
  0x38   : > { %p3056_p2 = pnand %p3054_p1, %p3432_p13  ;;  %p3062_p3 = scmp.lt.u32.totalorder %s3083_s24, %s3422_s17 }
  0x39   : > { %p3061_p10 = por %p3060_p8, %p3059_p6 }
  0x3a   : > { %p3057_p4 = pneg %p3056_p2 }
  0x3b   : > { %p3063_p5 = por %p3062_p3, %p3061_p10 }
  0x3d   : > { %p3064_p7 = pnand %p3063_p5, %p3057_p4 }
  0x3f   : > { %3067 = shalt.err (!%p3064_p7)
}
  0x40   : > { %s3068_s10 = scalar_lea.vmem %s289_s19, 16384  ;;  %p3076_p1 = scmp.lt.s32.totalorder %s289_s19, %s289_s19 }
  0x41   : > { %p3069_p9 = scmp.ne.s32.totalorder %s289_s19, %s3068_s10  ;;  %p3077_p2 = scmp.lt.s32.totalorder %s3068_s10, %s3068_s10 }
  0x43   : > { %p3071_p12 = pnand %p3069_p9, %p3432_p13  ;;  %p3078_p11 = por %p3077_p2, %p3076_p1 }
  0x45   : > { %p3072_p0 = pneg %p3071_p12 }
  0x47   : > { %p3079_p6 = pnand %p3078_p11, %p3072_p0 }
  0x49   : > { %3082 = shalt.err (!%p3079_p6)
}
  0x4a   : > { %p4230_p8 = scmp.ne.s32.totalorder %s4228_s14, 0  ;;  %s3084_s7 = scalar_lea.hbm %s4203_s5, 16384 }
  0x4b   : > { %p3085_p4 = scmp.ne.s32.totalorder %s4203_s5, %s3084_s7  ;;  %p3091_p3 = scmp.lt.u32.totalorder %s3084_s7, %s4203_s5 }
  0x4c   : > { %2797 = dma.hbm_to_vmem [thread:$0]  (!%p4230_p8), %s3422_s17, 16384, %s289_s19, [#allocation11], %s3302_s8, %s3303_s22, %s3304_s15  }
  0x4d   : > { %p3087_p11 = pnand %p3085_p4, %p3432_p13 }
  0x4f   : > { %p3088_p10 = pneg %p3087_p11 }
  0x51   : > { %p3093_p5 = pnand %p3091_p3, %p3088_p10 }
  0x53   : > { %3096 = shalt.err (!%p3093_p5)
}
  0x54   : > { %s3097_s16 = scalar_lea.vmem %s306_s21, 16384  ;;  %p3105_p0 = scmp.lt.s32.totalorder %s306_s21, %s306_s21 }
  0x55   : > { %p3098_p7 = scmp.ne.s32.totalorder %s306_s21, %s3097_s16  ;;  %p3106_p1 = scmp.lt.s32.totalorder %s3097_s16, %s3097_s16 }
  0x57   : > { %p3100_p9 = pnand %p3098_p7, %p3432_p13  ;;  %p3107_p2 = por %p3106_p1, %p3105_p0 }
  0x59   : > { %p3101_p12 = pneg %p3100_p9 }
  0x5b   : > { %p3108_p6 = pnand %p3107_p2, %p3101_p12 }
  0x5d   : > { %3111 = shalt.err (!%p3108_p6)
}
  0x5e   : > { %s3306_s17 = smov 256   ;;  %s3307_s19 = smov 16  }
  0x5f   : > { %2800 = dma.hbm_to_vmem [thread:$0]  (!%p4230_p8), %s4203_s5, 16384, %s306_s21, [#allocation11], %s3306_s17, %s3306_s17, %s3307_s19  }
  0x60   : > { %s50_s22 = sadd.s32 1, %s3286_s26  ;;  %s43_s15 = sadd.s32 1, %s3294_s28 }
  0x61   : > { %p57_p13 = scmp.ne.s32.totalorder %s3286_s26, %s3282_s25  ;;  %p45_p4 = scmp.ge.s32.totalorder %s43_s15, 2 }
  0x62   : > { %p58_p11 = scmp.eq.s32.totalorder %s3298_s29, 0  ;;  %p4231_p10 = scmp.eq.s32.totalorder %s3385_s30, 1 }
  0x63   : > { %p2818_p5 = scmp.lt.s32.totalorder %s3298_s29, 2  ;;  %s4256_s15 = smov (%p45_p4, %s43_s15), 0 }
  0x64   : > { %p3509_p3 = por %p4231_p10, %p57_p13  ;;  %p59_p7 = por %p58_p11, %p57_p13 }
  0x65   : > { %s319_s14 = sand.u32 1, %s3286_s26   ;;  %s47_s20 = ssub.s32 %s3294_s28, %s4256_s15 }
  0x66   : > { %p48_p9 = scmp.eq.s32.totalorder %s47_s20, 0  ;;  %s2305_s21 = sshll.u32 %s319_s14, 7 }
  0x67   : > { %s2364_s23 = sshll.u32 %s3294_s28, 11  ;;  %s323_s24 = scalar_lea.vmem [#allocation4], %s2305_s21 }
  0x68   : > { %s3521_s10 = scalar_select %p48_p9, %s3286_s26, %s50_s22  }
  0x69   : > { %s3526_s7 = scalar_lea.hbm %s4198_s0, %s2364_s23  ;;  %s331_s27 = sshll.u32 %s323_s24, 4  ;;  %s3528_s27 = int_to_ptr.vmem [resolvable:$true] %s331_s27 }
  0x6a   : > { %p3532_p8 = pnand %p2818_p5, %p59_p7  ;;  %s3539_s12 = scalar_lea.hbm %s4199_s1, %s2364_s23 }
  0x6b   : > { %s345_s8 = scalar_lea.vmem [#allocation7], %s2305_s21  ;;  %s3543_s20 = scalar_lea.sflag [#allocation5], %s319_s14 }
  0x6c   : > { %s3541_s22 = sshll.u32 %s345_s8, 4  ;;  %s3112_s2 = scalar_lea.hbm %s3526_s7, 2048  ;;  %s3575_s22 = int_to_ptr.vmem [resolvable:$true] %s3541_s22 }
  0x6d   : > { %p3113_p12 = scmp.ne.s32.totalorder %s3526_s7, %s3112_s2  ;;  %p3114_p0 = pneg %p3532_p8 }
  0x6e   : > { %s3117_s13 = scalar_lea.hbm %s4198_s0, 4096  ;;  %p3118_p6 = scmp.lt.u32.totalorder %s3526_s7, %s4198_s0 }
  0x6f   : > { %p3115_p1 = pnand %p3114_p0, %p3113_p12  ;;  %p3119_p13 = scmp.lt.u32.totalorder %s3117_s13, %s3112_s2 }
  0x70   : > { %p3121_p11 = scmp.lt.u32.totalorder %s3112_s2, %s3526_s7 }
  0x71   : > { %p3116_p2 = pneg %p3115_p1  ;;  %p3120_p4 = por %p3119_p13, %p3118_p6 }
  0x73   : > { %p3122_p10 = por %p3121_p11, %p3120_p4 }
  0x75   : > { %p3123_p5 = pnand %p3122_p10, %p3116_p2 }
  0x77   : > { %3126 = shalt.err (!%p3123_p5)
}
  0x78   : > { %s3127_s14 = scalar_lea.vmem %s3528_s27, 2048  ;;  %s3308_s21 = smov [#allocation4]  }
  0x79   : > { %p3128_p7 = scmp.ne.s32.totalorder %s3528_s27, %s3127_s14  ;;  %s3132_s8 = sshll.u32 %s3308_s21, 4  ;;  %s3133_s8 = int_to_ptr.vmem [resolvable:$false] %s3132_s8 }
  0x7a   : > { %s3134_s6 = scalar_lea.vmem %s3133_s8, 4096  ;;  %p3135_p1 = scmp.lt.s32.totalorder %s3528_s27, %s3133_s8 }
  0x7b   : > { %p3130_p9 = pnand %p3128_p7, %p3114_p0  ;;  %p3136_p6 = scmp.lt.s32.totalorder %s3134_s6, %s3127_s14 }
  0x7d   : > { %p3131_p12 = pneg %p3130_p9  ;;  %p3137_p13 = por %p3136_p6, %p3135_p1 }
  0x7f   : > { %p3138_p4 = pnand %p3137_p13, %p3131_p12 }
  0x81   : > { %3141 = shalt.err (!%p3138_p4)
}
  0x82   : > { %2804 = dma.hbm_to_vmem [thread:$0]  (!%p3532_p8), %s3526_s7, 2048, %s3528_s27, %s3543_s20, %s3306_s17, %s3306_s17, %s3307_s19  }
  0x83   : > { %s341_s2 = sand.u32 1, %s3298_s29   ;;  %s3142_s13 = scalar_lea.hbm %s3539_s12, 2048 }
  0x84   : > { %s3578_s24 = scalar_lea.sflag [#allocation8], %s341_s2  ;;  %p3143_p2 = scmp.ne.s32.totalorder %s3539_s12, %s3142_s13 }
  0x85   : > { %s3147_s14 = scalar_lea.hbm %s4199_s1, 4096  ;;  %p3148_p5 = scmp.lt.u32.totalorder %s3539_s12, %s4199_s1 }
  0x86   : > { %p3145_p11 = pnand %p3143_p2, %p3114_p0  ;;  %p3149_p7 = scmp.lt.u32.totalorder %s3147_s14, %s3142_s13 }
  0x87   : > { %p3151_p12 = scmp.lt.u32.totalorder %s3142_s13, %s3539_s12 }
  0x88   : > { %p3146_p10 = pneg %p3145_p11  ;;  %p3150_p9 = por %p3149_p7, %p3148_p5 }
  0x8a   : > { %p3152_p1 = por %p3151_p12, %p3150_p9 }
  0x8c   : > { %p3153_p6 = pnand %p3152_p1, %p3146_p10 }
  0x8e   : > { %3156 = shalt.err (!%p3153_p6)
}
  0x8f   : > { %s3157_s7 = scalar_lea.vmem %s3575_s22, 2048  ;;  %s3309_s27 = smov [#allocation7]  }
  0x90   : > { %p3158_p13 = scmp.ne.s32.totalorder %s3575_s22, %s3157_s7  ;;  %s3162_s20 = sshll.u32 %s3309_s27, 4  ;;  %s3163_s20 = int_to_ptr.vmem [resolvable:$false] %s3162_s20 }
  0x91   : > { %s3164_s6 = scalar_lea.vmem %s3163_s20, 4096  ;;  %p3165_p11 = scmp.lt.s32.totalorder %s3575_s22, %s3163_s20 }
  0x92   : > { %p3160_p4 = pnand %p3158_p13, %p3114_p0  ;;  %p3166_p5 = scmp.lt.s32.totalorder %s3164_s6, %s3157_s7 }
  0x94   : > { %p3161_p2 = pneg %p3160_p4  ;;  %p3167_p7 = por %p3166_p5, %p3165_p11 }
  0x96   : > { %p3168_p9 = pnand %p3167_p7, %p3161_p2 }
  0x98   : > { %3171 = shalt.err (!%p3168_p9)
}
  0x99   : > { %2807 = dma.hbm_to_vmem [thread:$0]  (!%p3532_p8), %s3539_s12, 2048, %s3575_s22, %s3578_s24, %s3306_s17, %s3306_s17, %s3307_s19  }
  0x9a   : > { %p4234_p0 = scmp.ne.s32.totalorder %s4227_s11, 0 }
  0x9b   : > { %s4235_s2 = sld [smem:[#allocation24_spill]] (!%p4234_p0)  ;;  %s3610_s13 = sand.u32 (!%p4234_p0), 1, %s3282_s25  }
  0x9c   : > { %365 = sbr.rel (%p4234_p0) target bundleno = 945 (0x3b1), region = 44  ;;  %s3613_s16 = sshll.u32 (!%p4234_p0), %s3610_s13, 7 }
  0x9d   : > { %s368_s9 = scalar_lea.sflag (!%p4234_p0), [#allocation5], %s3610_s13  ;;  %s3617_s23 = scalar_lea.vmem (!%p4234_p0), [#allocation4], %s3613_s16 }
  0xa1   : > { %p4236_p10 = scmp.ne.s32.totalorder (!%p4234_p0), %s4235_s2, 0 }
  0xa3   : > { %3253 = dma.done.wait (%p4236_p10), %s368_s9, 2048  }
  0xa4   : > { %3255 = vsyncadd (%p4236_p10), %s368_s9, 4294965248  ;;  %s376_s11 = sand.u32 1, %s3385_s30   ;;  %s3625_s19 = scalar_lea.vmem [#allocation7], %s3613_s16 }
  0xa5   : > { %s377_s17 = scalar_lea.sflag [#allocation8], %s376_s11 }
  0xa6   : > { %3257 = dma.done.wait (%p4236_p10), %s377_s17, 2048  }
  0xa7   : > { %3259 = vsyncadd (%p4236_p10), %s377_s17, 4294965248  ;;  %p4237_p8 = scmp.eq.s32.totalorder %s3385_s30, 0 }
  0xa9   : > { %3261 = dma.done.wait (%p4237_p8), [#allocation8], 16384   ;;  %p4238_p12 = pmov %p4237_p8 }
  0xaa   : > { %p4239_p1 = pmov %p4237_p8 }
  0xab   : > { %3263 = vsyncadd (%p4238_p12), [#allocation8], 4294950912 }
  0xac   : > { %3265 = dma.done.wait (%p4239_p1), [#allocation11], 32768   ;;  %p4240_p6 = pmov %p4239_p1 }
  0xad   : > { %v445_v0 = vld [vmem:[%s3617_s23] sm:$0xff]  ;;  %v446_v1 = vld [vmem:[%s3617_s23 + $0x8] sm:$0xff]  ;;  %v447_v5 = vld [vmem:[%s3617_s23 + $0x10] sm:$0xff]  ;;  %s3655_s30 = scalar_lea.vmem [#allocation14], %s3613_s16  ;;  %s4241_s24 = sld [smem:[#allocation26_spill]] }
  0xae   : > { %3267 = vsyncadd (%p4240_p6), [#allocation11], 4294934528  ;;  %v461_v2 = vld [vmem:[%s3625_s19] sm:$0xff]  ;;  %v462_v3 = vld [vmem:[%s3625_s19 + $0x8] sm:$0xff]  ;;  %s4242_s14 = sld [smem:[#allocation23_spill]]  ;;  %s4243_s27 = sld [smem:[#allocation28_spill]] }
  0xaf   : > { %v3643_v4 = vadd.f32 %v461_v2, %v445_v0  ;;  %v448_v6 = vld [vmem:[%s3617_s23 + $0x18] sm:$0xff]  ;;  %v3647_v7 = vadd.f32 %v462_v3, %v446_v1  ;;  %v463_v8 = vld [vmem:[%s3625_s19 + $0x10] sm:$0xff]  ;;  %v449_v10 = vld [vmem:[%s3617_s23 + $0x20] sm:$0xff]  ;;  %s2127_s2 = sshll.u32 %s3655_s30, 4  ;;  %s2096_s9 = scalar_lea.sflag [#allocation15], %s3610_s13  ;;  %s4090_s2 = int_to_ptr.vmem [resolvable:$true] %s2127_s2 }
  0xb0   : > { %v464_v9 = vld [vmem:[%s3625_s19 + $0x18] sm:$0xff]  ;;  %v3659_v12 = vadd.f32 %v463_v8, %v447_v5  ;;  %v450_v14 = vld [vmem:[%s3617_s23 + $0x28] sm:$0xff]  ;;  %v465_v15 = vld [vmem:[%s3625_s19 + $0x20] sm:$0xff]  ;;  %s3310_s11 = smov [#allocation14]  }
  0xb1   : > { %v509_v11 = vmul.f32 %v3643_v4, %v3643_v4  ;;  %493 = vst [vmem:[%s3655_s30] sm:$0xff] %v3643_v4  ;;  %v3661_v13 = vadd.f32 %v464_v9, %v448_v6  ;;  %v466_v16 = vld [vmem:[%s3625_s19 + $0x28] sm:$0xff]  ;;  %494 = vst [vmem:[%s3655_s30 + $0x8] sm:$0xff] %v3647_v7  ;;  %v510_v17 = vmul.f32 %v3647_v7, %v3647_v7  ;;  %v451_v20 = vld [vmem:[%s3617_s23 + $0x30] sm:$0xff]  ;;  %s3176_s17 = sshll.u32 %s3310_s11, 4  ;;  %s3177_s17 = int_to_ptr.vmem [resolvable:$false] %s3176_s17 }
  0xb2   : > { %v3670_v18 = vadd.f32 %v465_v15, %v449_v10  ;;  %v3672_v19 = vadd.f32 %v466_v16, %v450_v14  ;;  %v452_v21 = vld [vmem:[%s3617_s23 + $0x38] sm:$0xff]  ;;  %v467_v22 = vld [vmem:[%s3625_s19 + $0x30] sm:$0xff]  ;;  %495 = vst [vmem:[%s3655_s30 + $0x10] sm:$0xff] %v3659_v12  ;;  %v511_v23 = vmul.f32 %v3659_v12, %v3659_v12  ;;  %v453_v27 = vld [vmem:[%s3617_s23 + $0x40] sm:$0xff]  ;;  %p3179_p11 = scmp.lt.s32.totalorder %s4090_s2, %s3177_s17 }
  0xb3   : > { %496 = vst [vmem:[%s3655_s30 + $0x18] sm:$0xff] %v3661_v13  ;;  %v512_v24 = vmul.f32 %v3661_v13, %v3661_v13  ;;  %v468_v25 = vld [vmem:[%s3625_s19 + $0x38] sm:$0xff]  ;;  %v3686_v26 = vadd.f32 %v467_v22, %v451_v20  ;;  %v454_v28 = vld [vmem:[%s3617_s23 + $0x48] sm:$0xff]  ;;  %v525_v29 = vadd.f32 %v510_v17, %v509_v11  ;;  %v469_v33 = vld [vmem:[%s3625_s19 + $0x40] sm:$0xff] }
  0xb4   : > { %498 = vst [vmem:[%s3655_s30 + $0x28] sm:$0xff] %v3672_v19  ;;  %v513_v30 = vmul.f32 %v3670_v18, %v3670_v18  ;;  %v514_v31 = vmul.f32 %v3672_v19, %v3672_v19  ;;  %497 = vst [vmem:[%s3655_s30 + $0x20] sm:$0xff] %v3670_v18  ;;  %v3698_v32 = vadd.f32 %v468_v25, %v452_v21  ;;  %v470_v34 = vld [vmem:[%s3625_s19 + $0x48] sm:$0xff]  ;;  %v455_v35 = vld [vmem:[%s3617_s23 + $0x50] sm:$0xff]  ;;  %s2368_s21 = sshll.u32 %s4242_s14, 11  ;;  %s4244_s20 = smov %s4243_s27 }
  0xb5   : > { %v528_v36 = vadd.f32 %v512_v24, %v511_v23  ;;  %499 = vst [vmem:[%s3655_s30 + $0x30] sm:$0xff] %v3686_v26  ;;  %v515_v37 = vmul.f32 %v3686_v26, %v3686_v26  ;;  %v3707_v38 = vadd.f32 %v469_v33, %v453_v27  ;;  %v3709_v39 = vadd.f32 %v470_v34, %v454_v28  ;;  %v456_v40 = vld [vmem:[%s3617_s23 + $0x58] sm:$0xff]  ;;  %v471_v41 = vld [vmem:[%s3625_s19 + $0x50] sm:$0xff]  ;;  %v457_v47 = vld [vmem:[%s3617_s23 + $0x60] sm:$0xff]  ;;  %s4087_s6 = scalar_lea.hbm %s4243_s27, %s2368_s21 }
  0xb6   : > { %v472_v42 = vld [vmem:[%s3625_s19 + $0x58] sm:$0xff]  ;;  %526 = vadd.xlane.f32.xlu0 %v525_v29  ;;  %v531_v43 = vadd.f32 %v514_v31, %v513_v30  ;;  %500 = vst [vmem:[%s3655_s30 + $0x38] sm:$0xff] %v3698_v32  ;;  %v516_v44 = vmul.f32 %v3698_v32, %v3698_v32  ;;  %v3718_v45 = vadd.f32 %v471_v41, %v455_v35  ;;  %v458_v48 = vld [vmem:[%s3617_s23 + $0x68] sm:$0xff]  ;;  %v473_v49 = vld [vmem:[%s3625_s19 + $0x60] sm:$0xff] }
  0xb7   : > { %v3720_v46 = vadd.f32 %v472_v42, %v456_v40  ;;  %501 = vst [vmem:[%s3655_s30 + $0x40] sm:$0xff] %v3707_v38  ;;  %502 = vst [vmem:[%s3655_s30 + $0x48] sm:$0xff] %v3709_v39  ;;  %v517_v50 = vmul.f32 %v3707_v38, %v3707_v38  ;;  %v518_v51 = vmul.f32 %v3709_v39, %v3709_v39  ;;  %v474_v52 = vld [vmem:[%s3625_s19 + $0x68] sm:$0xff]  ;;  %v459_v54 = vld [vmem:[%s3617_s23 + $0x70] sm:$0xff] }
  0xb8   : > { %v3734_v53 = vadd.f32 %v473_v49, %v457_v47  ;;  %v460_v55 = vld [vmem:[%s3617_s23 + $0x78] sm:$0xff]  ;;  %532 = vadd.xlane.f32.xlu1 %v531_v43  ;;  %v534_v56 = vadd.f32 %v516_v44, %v515_v37  ;;  %503 = vst [vmem:[%s3655_s30 + $0x50] sm:$0xff] %v3718_v45  ;;  %v519_v57 = vmul.f32 %v3718_v45, %v3718_v45  ;;  %v475_v60 = vld [vmem:[%s3625_s19 + $0x70] sm:$0xff]  ;;  %v651_v62 = vld [vmem:[#allocation9 + $0x8] sm:$0xff]  ;;  %s3172_s23 = scalar_lea.vmem %s4090_s2, 2048 }
  0xb9   : > { %504 = vst [vmem:[%s3655_s30 + $0x58] sm:$0xff] %v3720_v46  ;;  %v520_v58 = vmul.f32 %v3720_v46, %v3720_v46  ;;  %v3746_v59 = vadd.f32 %v474_v52, %v458_v48  ;;  %v476_v61 = vld [vmem:[%s3625_s19 + $0x78] sm:$0xff]  ;;  %v537_v63 = vadd.f32 %v518_v51, %v517_v50  ;;  %v3752_v0 = vadd.f32 %v475_v60, %v459_v54  ;;  %v655_v2 = vld [vmem:[#allocation9 + $0x28] sm:$0xff]  ;;  %v650_v3 = vld [vmem:[#allocation9] sm:$0xff]  ;;  %p3173_p13 = scmp.ne.s32.totalorder %s4090_s2, %s3172_s23  ;;  %s3178_s19 = scalar_lea.vmem %s3177_s17, 4096 }
  0xba   : > { %505 = vst [vmem:[%s3655_s30 + $0x60] sm:$0xff] %v3734_v53  ;;  %v3754_v1 = vadd.f32 %v476_v61, %v460_v55  ;;  %v654_v5 = vld [vmem:[#allocation9 + $0x20] sm:$0xff]  ;;  %529 = vadd.xlane.f32.xlu0 %v528_v36  ;;  %v521_v6 = vmul.f32 %v3734_v53, %v3734_v53  ;;  %v2371_v9 = vpack.c.bf16 %v655_v2, %v651_v62  ;;  %v1005_v11 = vld [vmem:[#allocation10 + $0x8] sm:$0xff]  ;;  %p3180_p5 = scmp.lt.s32.totalorder %s3178_s19, %s3172_s23 }
  0xbb   : > { %506 = vst [vmem:[%s3655_s30 + $0x68] sm:$0xff] %v3746_v59  ;;  %v522_v8 = vmul.f32 %v3746_v59, %v3746_v59  ;;  %v2373_v10 = vpack.c.bf16 %v654_v5, %v650_v3  ;;  %v1009_v14 = vld [vmem:[#allocation10 + $0x28] sm:$0xff]  ;;  %v1004_v15 = vld [vmem:[#allocation10] sm:$0xff]  ;;  %v540_v16 = vadd.f32 %v520_v58, %v519_v57  ;;  %507 = vst [vmem:[%s3655_s30 + $0x70] sm:$0xff] %v3752_v0  ;;  %p3174_p4 = pnand %p3173_p13, %p3509_p3 }
  0xbc   : > { %508 = vst [vmem:[%s3655_s30 + $0x78] sm:$0xff] %v3754_v1  ;;  %v523_v17 = vmul.f32 %v3752_v0, %v3752_v0  ;;  %v2499_v20 = vpack.c.bf16 %v1009_v14, %v1005_v11  ;;  %v1008_v21 = vld [vmem:[#allocation10 + $0x20] sm:$0xff]  ;;  %v659_v22 = vld [vmem:[#allocation9 + $0x48] sm:$0xff]  ;;  %535 = vadd.xlane.f32.xlu1 %v534_v56  ;;  %v524_v24 = vmul.f32 %v3754_v1, %v3754_v1  ;;  %p3181_p7 = por %p3180_p5, %p3179_p11 }
  0xbd   : > { %v663_v23 = vld [vmem:[#allocation9 + $0x68] sm:$0xff]  ;;  %2372 = vmatprep.subr.bf16.mxu1 %v2371_v9  ;;  %v2501_v25 = vpack.c.bf16 %v1008_v21, %v1004_v15  ;;  %v658_v28 = vld [vmem:[#allocation9 + $0x40] sm:$0xff]  ;;  %v543_v36 = vadd.f32 %v522_v8, %v521_v6  ;;  %p3175_p2 = pneg %p3174_p4 }
  0xbe   : > { %v2375_v27 = vpack.c.bf16 %v663_v23, %v659_v22  ;;  %v662_v29 = vld [vmem:[#allocation9 + $0x60] sm:$0xff]  ;;  %v1013_v30 = vld [vmem:[#allocation10 + $0x48] sm:$0xff]  ;;  %2374 = vmatpush1.bf16.msra.mxu1 %v2373_v10  ;;  %2500 = vmatprep.subr.bf16.mxu0 %v2499_v20  ;;  %v546_v50 = vadd.f32 %v524_v24, %v523_v17 }
  0xbf   : > { %v2377_v31 = vpack.c.bf16 %v662_v29, %v658_v28  ;;  %v1017_v33 = vld [vmem:[#allocation10 + $0x68] sm:$0xff]  ;;  %v1012_v34 = vld [vmem:[#allocation10 + $0x40] sm:$0xff]  ;;  %538 = vadd.xlane.f32.xlu0 %v537_v63  ;;  %2502 = vmatpush1.bf16.msra.mxu0 %v2501_v25  ;;  %p3182_p9 = pnand %p3181_p7, %p3175_p2 }
  0xc0   : > { %v1016_v35 = vld [vmem:[#allocation10 + $0x60] sm:$0xff]  ;;  %v2503_v37 = vpack.c.bf16 %v1017_v33, %v1013_v30  ;;  %v667_v41 = vld [vmem:[#allocation9 + $0x88] sm:$0xff]  ;;  %2376 = vmatprep.subr.bf16.mxu1 %v2375_v27  ;;  %541 = vadd.xlane.f32.xlu1 %v540_v16 }
  0xc1   : > { %v2505_v40 = vpack.c.bf16 %v1016_v35, %v1012_v34  ;;  %v671_v42 = vld [vmem:[#allocation9 + $0xa8] sm:$0xff]  ;;  %v666_v43 = vld [vmem:[#allocation9 + $0x80] sm:$0xff] }
  0xc2   : > { %v2379_v44 = vpack.c.bf16 %v671_v42, %v667_v41  ;;  %v670_v47 = vld [vmem:[#allocation9 + $0xa0] sm:$0xff]  ;;  %v1021_v48 = vld [vmem:[#allocation10 + $0x88] sm:$0xff]  ;;  %2504 = vmatprep.subr.bf16.mxu0 %v2503_v37  ;;  %2378 = vmatpush1.bf16.msra.mxu1 %v2377_v31 }
  0xc3   : > { %v1025_v49 = vld [vmem:[#allocation10 + $0xa8] sm:$0xff]  ;;  %v1020_v52 = vld [vmem:[#allocation10 + $0x80] sm:$0xff]  ;;  %v2381_v56 = vpack.c.bf16 %v670_v47, %v666_v43  ;;  %544 = vadd.xlane.f32.xlu0 %v543_v36  ;;  %2506 = vmatpush1.bf16.msra.mxu0 %v2505_v40 }
  0xc4   : > { %v2507_v51 = vpack.c.bf16 %v1025_v49, %v1021_v48  ;;  %v1024_v54 = vld [vmem:[#allocation10 + $0xa0] sm:$0xff]  ;;  %v675_v55 = vld [vmem:[#allocation9 + $0xc8] sm:$0xff]  ;;  %2380 = vmatprep.subr.bf16.mxu1 %v2379_v44  ;;  %547 = vadd.xlane.f32.xlu1 %v546_v50 }
  0xc5   : > { %v679_v57 = vld [vmem:[#allocation9 + $0xe8] sm:$0xff]  ;;  %v674_v58 = vld [vmem:[#allocation9 + $0xc0] sm:$0xff]  ;;  %v2509_v61 = vpack.c.bf16 %v1024_v54, %v1020_v52 }
  0xc6   : > { %v678_v60 = vld [vmem:[#allocation9 + $0xe0] sm:$0xff]  ;;  %v2383_v62 = vpack.c.bf16 %v679_v57, %v675_v55  ;;  %v1029_v63 = vld [vmem:[#allocation10 + $0xc8] sm:$0xff]  ;;  %2508 = vmatprep.subr.bf16.mxu0 %v2507_v51  ;;  %2382 = vmatpush1.bf16.msra.mxu1 %v2381_v56 }
  0xc7   : > { %v1033_v2 = vld [vmem:[#allocation10 + $0xe8] sm:$0xff]  ;;  %v1028_v3 = vld [vmem:[#allocation10 + $0xc0] sm:$0xff]  ;;  %v2385_v11 = vpack.c.bf16 %v678_v60, %v674_v58  ;;  %2510 = vmatpush1.bf16.msra.mxu0 %v2509_v61 }
  0xc8   : > { %v2511_v5 = vpack.c.bf16 %v1033_v2, %v1029_v63  ;;  %v1032_v6 = vld [vmem:[#allocation10 + $0xe0] sm:$0xff]  ;;  %v683_v8 = vld [vmem:[#allocation9 + $0x108] sm:$0xff]  ;;  %2384 = vmatprep.subr.bf16.mxu1 %v2383_v62 }
  0xc9   : > { %v687_v9 = vld [vmem:[#allocation9 + $0x128] sm:$0xff]  ;;  %v2513_v15 = vpack.c.bf16 %v1032_v6, %v1028_v3  ;;  %v682_v17 = vld [vmem:[#allocation9 + $0x100] sm:$0xff] }
  0xca   : > { %v1037_v10 = vld [vmem:[#allocation10 + $0x108] sm:$0xff]  ;;  %v2387_v16 = vpack.c.bf16 %v687_v9, %v683_v8  ;;  %v686_v20 = vld [vmem:[#allocation9 + $0x120] sm:$0xff]  ;;  %2512 = vmatprep.subr.bf16.mxu0 %v2511_v5  ;;  %2386 = vmatpush1.bf16.msra.mxu1 %v2385_v11 }
  0xcb   : > { %v1041_v14 = vld [vmem:[#allocation10 + $0x128] sm:$0xff]  ;;  %v1036_v21 = vld [vmem:[#allocation10 + $0x100] sm:$0xff]  ;;  %v2389_v29 = vpack.c.bf16 %v686_v20, %v682_v17  ;;  %2514 = vmatpush1.bf16.msra.mxu0 %v2513_v15 }
  0xcc   : > { %v2515_v22 = vpack.c.bf16 %v1041_v14, %v1037_v10  ;;  %v1040_v23 = vld [vmem:[#allocation10 + $0x120] sm:$0xff]  ;;  %v691_v24 = vld [vmem:[#allocation9 + $0x148] sm:$0xff]  ;;  %2388 = vmatprep.subr.bf16.mxu1 %v2387_v16 }
  0xcd   : > { %v695_v25 = vld [vmem:[#allocation9 + $0x168] sm:$0xff]  ;;  %v2517_v30 = vpack.c.bf16 %v1040_v23, %v1036_v21  ;;  %v690_v33 = vld [vmem:[#allocation9 + $0x140] sm:$0xff] }
  0xce   : > { %v1045_v27 = vld [vmem:[#allocation10 + $0x148] sm:$0xff]  ;;  %v2391_v31 = vpack.c.bf16 %v695_v25, %v691_v24  ;;  %v694_v34 = vld [vmem:[#allocation9 + $0x160] sm:$0xff]  ;;  %2516 = vmatprep.subr.bf16.mxu0 %v2515_v22  ;;  %2390 = vmatpush1.bf16.msra.mxu1 %v2389_v29 }
  0xcf   : > { %v1049_v28 = vld [vmem:[#allocation10 + $0x168] sm:$0xff]  ;;  %v1044_v35 = vld [vmem:[#allocation10 + $0x140] sm:$0xff]  ;;  %v2393_v44 = vpack.c.bf16 %v694_v34, %v690_v33  ;;  %2518 = vmatpush1.bf16.msra.mxu0 %v2517_v30 }
  0xd0   : > { %v2519_v36 = vpack.c.bf16 %v1049_v28, %v1045_v27  ;;  %v1048_v37 = vld [vmem:[#allocation10 + $0x160] sm:$0xff]  ;;  %v699_v40 = vld [vmem:[#allocation9 + $0x188] sm:$0xff]  ;;  %2392 = vmatprep.subr.bf16.mxu1 %v2391_v31 }
  0xd1   : > { %v703_v41 = vld [vmem:[#allocation9 + $0x1a8] sm:$0xff]  ;;  %v2521_v47 = vpack.c.bf16 %v1048_v37, %v1044_v35  ;;  %v698_v49 = vld [vmem:[#allocation9 + $0x180] sm:$0xff] }
  0xd2   : > { %v1053_v42 = vld [vmem:[#allocation10 + $0x188] sm:$0xff]  ;;  %v2395_v48 = vpack.c.bf16 %v703_v41, %v699_v40  ;;  %v702_v50 = vld [vmem:[#allocation9 + $0x1a0] sm:$0xff]  ;;  %2520 = vmatprep.subr.bf16.mxu0 %v2519_v36  ;;  %2394 = vmatpush1.bf16.msra.mxu1 %v2393_v44 }
  0xd3   : > { %v1057_v43 = vld [vmem:[#allocation10 + $0x1a8] sm:$0xff]  ;;  %v1052_v51 = vld [vmem:[#allocation10 + $0x180] sm:$0xff]  ;;  %v2397_v60 = vpack.c.bf16 %v702_v50, %v698_v49  ;;  %2522 = vmatpush1.bf16.msra.mxu0 %v2521_v47 }
  0xd4   : > { %v2523_v52 = vpack.c.bf16 %v1057_v43, %v1053_v42  ;;  %v1056_v54 = vld [vmem:[#allocation10 + $0x1a0] sm:$0xff]  ;;  %v707_v55 = vld [vmem:[#allocation9 + $0x1c8] sm:$0xff]  ;;  %2396 = vmatprep.subr.bf16.mxu1 %v2395_v48 }
  0xd5   : > { %v711_v56 = vld [vmem:[#allocation9 + $0x1e8] sm:$0xff]  ;;  %v2525_v61 = vpack.c.bf16 %v1056_v54, %v1052_v51  ;;  %v706_v63 = vld [vmem:[#allocation9 + $0x1c0] sm:$0xff] }
  0xd6   : > { %v1061_v57 = vld [vmem:[#allocation10 + $0x1c8] sm:$0xff]  ;;  %v2399_v62 = vpack.c.bf16 %v711_v56, %v707_v55  ;;  %v710_v2 = vld [vmem:[#allocation9 + $0x1e0] sm:$0xff]  ;;  %2524 = vmatprep.subr.bf16.mxu0 %v2523_v52  ;;  %2398 = vmatpush1.bf16.msra.mxu1 %v2397_v60 }
  0xd7   : > { %v1065_v58 = vld [vmem:[#allocation10 + $0x1e8] sm:$0xff]  ;;  %v1060_v3 = vld [vmem:[#allocation10 + $0x1c0] sm:$0xff]  ;;  %v2401_v14 = vpack.c.bf16 %v710_v2, %v706_v63  ;;  %2526 = vmatpush1.bf16.msra.mxu0 %v2525_v61 }
  0xd8   : > { %v2527_v5 = vpack.c.bf16 %v1065_v58, %v1061_v57  ;;  %v1064_v6 = vld [vmem:[#allocation10 + $0x1e0] sm:$0xff]  ;;  %v715_v8 = vld [vmem:[#allocation9 + $0x208] sm:$0xff]  ;;  %2400 = vmatprep.subr.bf16.mxu1 %v2399_v62 }
  0xd9   : > { %v719_v9 = vld [vmem:[#allocation9 + $0x228] sm:$0xff]  ;;  %v2529_v15 = vpack.c.bf16 %v1064_v6, %v1060_v3  ;;  %v714_v17 = vld [vmem:[#allocation9 + $0x200] sm:$0xff] }
  0xda   : > { %v1069_v10 = vld [vmem:[#allocation10 + $0x208] sm:$0xff]  ;;  %v2403_v16 = vpack.c.bf16 %v719_v9, %v715_v8  ;;  %v718_v20 = vld [vmem:[#allocation9 + $0x220] sm:$0xff]  ;;  %2528 = vmatprep.subr.bf16.mxu0 %v2527_v5  ;;  %2402 = vmatpush1.bf16.msra.mxu1 %v2401_v14 }
  0xdb   : > { %v1073_v11 = vld [vmem:[#allocation10 + $0x228] sm:$0xff]  ;;  %v1068_v21 = vld [vmem:[#allocation10 + $0x200] sm:$0xff]  ;;  %v2405_v29 = vpack.c.bf16 %v718_v20, %v714_v17  ;;  %2530 = vmatpush1.bf16.msra.mxu0 %v2529_v15 }
  0xdc   : > { %v2531_v22 = vpack.c.bf16 %v1073_v11, %v1069_v10  ;;  %v1072_v23 = vld [vmem:[#allocation10 + $0x220] sm:$0xff]  ;;  %v723_v24 = vld [vmem:[#allocation9 + $0x248] sm:$0xff]  ;;  %2404 = vmatprep.subr.bf16.mxu1 %v2403_v16 }
  0xdd   : > { %v727_v25 = vld [vmem:[#allocation9 + $0x268] sm:$0xff]  ;;  %v2533_v30 = vpack.c.bf16 %v1072_v23, %v1068_v21  ;;  %v722_v33 = vld [vmem:[#allocation9 + $0x240] sm:$0xff] }
  0xde   : > { %v1077_v27 = vld [vmem:[#allocation10 + $0x248] sm:$0xff]  ;;  %v2407_v31 = vpack.c.bf16 %v727_v25, %v723_v24  ;;  %v726_v34 = vld [vmem:[#allocation9 + $0x260] sm:$0xff]  ;;  %2532 = vmatprep.subr.bf16.mxu0 %v2531_v22  ;;  %2406 = vmatpush1.bf16.msra.mxu1 %v2405_v29 }
  0xdf   : > { %v1081_v28 = vld [vmem:[#allocation10 + $0x268] sm:$0xff]  ;;  %v1076_v35 = vld [vmem:[#allocation10 + $0x240] sm:$0xff]  ;;  %v2409_v44 = vpack.c.bf16 %v726_v34, %v722_v33  ;;  %2534 = vmatpush1.bf16.msra.mxu0 %v2533_v30 }
  0xe0   : > { %v2535_v36 = vpack.c.bf16 %v1081_v28, %v1077_v27  ;;  %v1080_v37 = vld [vmem:[#allocation10 + $0x260] sm:$0xff]  ;;  %v731_v40 = vld [vmem:[#allocation9 + $0x288] sm:$0xff]  ;;  %2408 = vmatprep.subr.bf16.mxu1 %v2407_v31 }
  0xe1   : > { %v735_v41 = vld [vmem:[#allocation9 + $0x2a8] sm:$0xff]  ;;  %v2537_v47 = vpack.c.bf16 %v1080_v37, %v1076_v35  ;;  %v730_v49 = vld [vmem:[#allocation9 + $0x280] sm:$0xff] }
  0xe2   : > { %v1085_v42 = vld [vmem:[#allocation10 + $0x288] sm:$0xff]  ;;  %v2411_v48 = vpack.c.bf16 %v735_v41, %v731_v40  ;;  %v734_v50 = vld [vmem:[#allocation9 + $0x2a0] sm:$0xff]  ;;  %2536 = vmatprep.subr.bf16.mxu0 %v2535_v36  ;;  %2410 = vmatpush1.bf16.msra.mxu1 %v2409_v44 }
  0xe3   : > { %v1089_v43 = vld [vmem:[#allocation10 + $0x2a8] sm:$0xff]  ;;  %v1084_v51 = vld [vmem:[#allocation10 + $0x280] sm:$0xff]  ;;  %v2413_v60 = vpack.c.bf16 %v734_v50, %v730_v49  ;;  %2538 = vmatpush1.bf16.msra.mxu0 %v2537_v47 }
  0xe4   : > { %v2539_v52 = vpack.c.bf16 %v1089_v43, %v1085_v42  ;;  %v1088_v54 = vld [vmem:[#allocation10 + $0x2a0] sm:$0xff]  ;;  %v739_v55 = vld [vmem:[#allocation9 + $0x2c8] sm:$0xff]  ;;  %2412 = vmatprep.subr.bf16.mxu1 %v2411_v48 }
  0xe5   : > { %v743_v56 = vld [vmem:[#allocation9 + $0x2e8] sm:$0xff]  ;;  %v2541_v61 = vpack.c.bf16 %v1088_v54, %v1084_v51  ;;  %v738_v63 = vld [vmem:[#allocation9 + $0x2c0] sm:$0xff] }
  0xe6   : > { %v1093_v57 = vld [vmem:[#allocation10 + $0x2c8] sm:$0xff]  ;;  %v2415_v62 = vpack.c.bf16 %v743_v56, %v739_v55  ;;  %v742_v2 = vld [vmem:[#allocation9 + $0x2e0] sm:$0xff]  ;;  %2540 = vmatprep.subr.bf16.mxu0 %v2539_v52  ;;  %2414 = vmatpush1.bf16.msra.mxu1 %v2413_v60 }
  0xe7   : > { %v1097_v58 = vld [vmem:[#allocation10 + $0x2e8] sm:$0xff]  ;;  %v1092_v3 = vld [vmem:[#allocation10 + $0x2c0] sm:$0xff]  ;;  %v2417_v14 = vpack.c.bf16 %v742_v2, %v738_v63  ;;  %2542 = vmatpush1.bf16.msra.mxu0 %v2541_v61 }
  0xe8   : > { %v2543_v5 = vpack.c.bf16 %v1097_v58, %v1093_v57  ;;  %v1096_v6 = vld [vmem:[#allocation10 + $0x2e0] sm:$0xff]  ;;  %v747_v8 = vld [vmem:[#allocation9 + $0x308] sm:$0xff]  ;;  %2416 = vmatprep.subr.bf16.mxu1 %v2415_v62 }
  0xe9   : > { %v751_v9 = vld [vmem:[#allocation9 + $0x328] sm:$0xff]  ;;  %v2545_v15 = vpack.c.bf16 %v1096_v6, %v1092_v3  ;;  %v746_v17 = vld [vmem:[#allocation9 + $0x300] sm:$0xff] }
  0xea   : > { %v1101_v10 = vld [vmem:[#allocation10 + $0x308] sm:$0xff]  ;;  %v2419_v16 = vpack.c.bf16 %v751_v9, %v747_v8  ;;  %v750_v20 = vld [vmem:[#allocation9 + $0x320] sm:$0xff]  ;;  %2544 = vmatprep.subr.bf16.mxu0 %v2543_v5  ;;  %2418 = vmatpush1.bf16.msra.mxu1 %v2417_v14  ;;  %v653_v8 = vld [vmem:[#allocation9 + $0x18] sm:$0xff] }
  0xeb   : > { %v1105_v11 = vld [vmem:[#allocation10 + $0x328] sm:$0xff]  ;;  %v1100_v21 = vld [vmem:[#allocation10 + $0x300] sm:$0xff]  ;;  %v2421_v29 = vpack.c.bf16 %v750_v20, %v746_v17  ;;  %2546 = vmatpush1.bf16.msra.mxu0 %v2545_v15  ;;  %v657_v9 = vld [vmem:[#allocation9 + $0x38] sm:$0xff]  ;;  %v592_v20 = vlaneseq }
  0xec   : > { %v2547_v22 = vpack.c.bf16 %v1105_v11, %v1101_v10  ;;  %v1104_v23 = vld [vmem:[#allocation10 + $0x320] sm:$0xff]  ;;  %v755_v24 = vld [vmem:[#allocation9 + $0x348] sm:$0xff]  ;;  %2420 = vmatprep.subr.bf16.mxu1 %v2419_v16  ;;  %v2435_v14 = vpack.c.bf16 %v657_v9, %v653_v8 }
  0xed   : > { %v759_v25 = vld [vmem:[#allocation9 + $0x368] sm:$0xff]  ;;  %v2549_v30 = vpack.c.bf16 %v1104_v23, %v1100_v21  ;;  %v754_v33 = vld [vmem:[#allocation9 + $0x340] sm:$0xff] }
  0xee   : > { %v1109_v27 = vld [vmem:[#allocation10 + $0x348] sm:$0xff]  ;;  %v2423_v31 = vpack.c.bf16 %v759_v25, %v755_v24  ;;  %v758_v34 = vld [vmem:[#allocation9 + $0x360] sm:$0xff]  ;;  %2548 = vmatprep.subr.bf16.mxu0 %v2547_v22  ;;  %2422 = vmatpush1.bf16.msra.mxu1 %v2421_v29 }
  0xef   : > { %v1113_v28 = vld [vmem:[#allocation10 + $0x368] sm:$0xff]  ;;  %v1108_v35 = vld [vmem:[#allocation10 + $0x340] sm:$0xff]  ;;  %v2425_v44 = vpack.c.bf16 %v758_v34, %v754_v33  ;;  %2550 = vmatpush1.bf16.msra.mxu0 %v2549_v30 }
  0xf0   : > { %v2551_v36 = vpack.c.bf16 %v1113_v28, %v1109_v27  ;;  %v1112_v37 = vld [vmem:[#allocation10 + $0x360] sm:$0xff]  ;;  %v763_v40 = vld [vmem:[#allocation9 + $0x388] sm:$0xff]  ;;  %2424 = vmatprep.subr.bf16.mxu1 %v2423_v31  ;;  %v593_v28 = vshrl.u32 %v592_v20, 7 }
  0xf1   : > { %v767_v41 = vld [vmem:[#allocation9 + $0x3a8] sm:$0xff]  ;;  %v2553_v47 = vpack.c.bf16 %v1112_v37, %v1108_v35  ;;  %v762_v49 = vld [vmem:[#allocation9 + $0x380] sm:$0xff] }
  0xf2   : > { %v1117_v42 = vld [vmem:[#allocation10 + $0x388] sm:$0xff]  ;;  %v2427_v48 = vpack.c.bf16 %v767_v41, %v763_v40  ;;  %v766_v50 = vld [vmem:[#allocation9 + $0x3a0] sm:$0xff]  ;;  %2552 = vmatprep.subr.bf16.mxu0 %v2551_v36  ;;  %2426 = vmatpush1.bf16.msra.mxu1 %v2425_v44  ;;  %v598_v36 = vsub.s32 1, %v593_v28  ;;  %v594_v37 = vsub.s32 0, %v593_v28 }
  0xf3   : > { %v1121_v43 = vld [vmem:[#allocation10 + $0x3a8] sm:$0xff]  ;;  %v1116_v51 = vld [vmem:[#allocation10 + $0x380] sm:$0xff]  ;;  %v2429_v60 = vpack.c.bf16 %v766_v50, %v762_v49  ;;  %2554 = vmatpush1.bf16.msra.mxu0 %v2553_v47 }
  0xf4   : > { %v2555_v52 = vpack.c.bf16 %v1121_v43, %v1117_v42  ;;  %v1120_v54 = vld [vmem:[#allocation10 + $0x3a0] sm:$0xff]  ;;  %v771_v55 = vld [vmem:[#allocation9 + $0x3c8] sm:$0xff]  ;;  %2428 = vmatprep.subr.bf16.mxu1 %v2427_v48 }
  0xf5   : > { %v775_v56 = vld [vmem:[#allocation9 + $0x3e8] sm:$0xff]  ;;  %v2557_v61 = vpack.c.bf16 %v1120_v54, %v1116_v51  ;;  %v770_v63 = vld [vmem:[#allocation9 + $0x3c0] sm:$0xff]  ;;  %v656_v54 = vld [vmem:[#allocation9 + $0x30] sm:$0xff] }
  0xf6   : > { %v1125_v57 = vld [vmem:[#allocation10 + $0x3c8] sm:$0xff]  ;;  %v2431_v62 = vpack.c.bf16 %v775_v56, %v771_v55  ;;  %v774_v2 = vld [vmem:[#allocation9 + $0x3e0] sm:$0xff]  ;;  %2556 = vmatprep.subr.bf16.mxu0 %v2555_v52  ;;  %2430 = vmatpush1.bf16.msra.mxu1 %v2429_v60  ;;  %v652_v52 = vld [vmem:[#allocation9 + $0x10] sm:$0xff] }
  0xf7   : > { %v1129_v58 = vld [vmem:[#allocation10 + $0x3e8] sm:$0xff]  ;;  %v1124_v3 = vld [vmem:[#allocation10 + $0x3c0] sm:$0xff]  ;;  %v2433_v10 = vpack.c.bf16 %v774_v2, %v770_v63  ;;  %2558 = vmatpush1.bf16.msra.mxu0 %v2557_v61 }
  0xf8   : > { %v2559_v5 = vpack.c.bf16 %v1129_v58, %v1125_v57  ;;  %v1128_v6 = vld [vmem:[#allocation10 + $0x3e0] sm:$0xff]  ;;  %2432 = vmatprep.subr.bf16.mxu1 %v2431_v62  ;;  %v661_v57 = vld [vmem:[#allocation9 + $0x58] sm:$0xff] }
  0xf9   : > { %v2561_v11 = vpack.c.bf16 %v1128_v6, %v1124_v3  ;;  %v590_v42 = vld [vmem:[%s4241_s24] sm:$0x3]  ;;  %v665_v58 = vld [vmem:[#allocation9 + $0x78] sm:$0xff]  ;;  %v2437_v3 = vpack.c.bf16 %v656_v54, %v652_v52  ;;  %v664_v6 = vld [vmem:[#allocation9 + $0x70] sm:$0xff] }
  0xfa   : > { %2560 = vmatprep.subr.bf16.mxu0 %v2559_v5  ;;  %2434 = vmatpush1.bf16.msra.mxu1 %v2433_v10  ;;  %v3773_v48 = vrot.slane %v590_v42, %v598_v36  ;;  %v3775_v49 = vrot.slane %v590_v42, %v594_v37  ;;  %v660_v5 = vld [vmem:[#allocation9 + $0x50] sm:$0xff]  ;;  %v2439_v9 = vpack.c.bf16 %v665_v58, %v661_v57  ;;  %v685_v37 = vld [vmem:[#allocation9 + $0x118] sm:$0xff] }
  0xfb   : > { %2562 = vmatpush1.bf16.msra.mxu0 %v2561_v11  ;;  %2436 = vmatprep.subr.bf16.mxu1 %v2435_v14  ;;  %v669_v11 = vld [vmem:[#allocation9 + $0x98] sm:$0xff]  ;;  %v680_v36 = vld [vmem:[#allocation9 + $0xf0] sm:$0xff] }
  0xfc   : > { %v673_v14 = vld [vmem:[#allocation9 + $0xb8] sm:$0xff] }
  0xfd   : > { %v693_v52 = vld [vmem:[#allocation9 + $0x158] sm:$0xff] }
  0xfe   : > { %v697_v54 = vld [vmem:[#allocation9 + $0x178] sm:$0xff] }
 0x143   : > { %v527_v15 = vpop.xlane.xlu0 %526 }
 0x144   : > { %v550_v16 = vmul.f32 0.00390625, %v527_v15 }
 0x145   : > { %v533_v17 = vpop.xlane.xlu1 %532 }
 0x146   : > { %v558_v21 = vadd.f32 1e-06, %v550_v16  ;;  %v552_v22 = vmul.f32 0.00390625, %v533_v17  ;;  %v2441_v16 = vpack.c.bf16 %v664_v6, %v660_v5  ;;  %v705_v5 = vld [vmem:[#allocation9 + $0x1b8] sm:$0xff] }
 0x147   : > { %v530_v23 = vpop.xlane.xlu0 %529 }
 0x148   : > { %2881 = vrsqrt.f32 %v558_v21  ;;  %v551_v24 = vmul.f32 0.00390625, %v530_v23  ;;  %v560_v25 = vadd.f32 1e-06, %v552_v22  ;;  %v2443_v23 = vpack.c.bf16 %v673_v14, %v669_v11  ;;  %v709_v11 = vld [vmem:[#allocation9 + $0x1d8] sm:$0xff] }
 0x149   : > { %v536_v27 = vpop.xlane.xlu1 %535  ;;  %v713_v14 = vld [vmem:[#allocation9 + $0x1f8] sm:$0xff] }
 0x14a   : > { %v559_v29 = vadd.f32 1e-06, %v551_v24  ;;  %2883 = vrsqrt.f32 %v560_v25  ;;  %v553_v30 = vmul.f32 0.00390625, %v536_v27  ;;  %v668_v24 = vld [vmem:[#allocation9 + $0x90] sm:$0xff]  ;;  %v681_v27 = vld [vmem:[#allocation9 + $0xf8] sm:$0xff] }
 0x14b   : > { %v672_v25 = vld [vmem:[#allocation9 + $0xb0] sm:$0xff] }
 0x14c   : > { %v539_v31 = vpop.xlane.xlu0 %538  ;;  %2885 = vrsqrt.f32 %v559_v29  ;;  %v561_v33 = vadd.f32 1e-06, %v553_v30 }
 0x14d   : > { %v554_v34 = vmul.f32 0.00390625, %v539_v31  ;;  %v542_v35 = vpop.xlane.xlu1 %541 }
 0x14e   : > { %2887 = vrsqrt.f32 %v561_v33  ;;  %v555_v41 = vmul.f32 0.00390625, %v542_v35  ;;  %v676_v35 = vld [vmem:[#allocation9 + $0xd0] sm:$0xff] }
 0x14f   : > { %v562_v40 = vadd.f32 1e-06, %v554_v34 }
 0x150   : > { %v545_v43 = vpop.xlane.xlu0 %544  ;;  %v563_v44 = vadd.f32 1e-06, %v555_v41 }
 0x151   : > { %2889 = vrsqrt.f32 %v562_v40  ;;  %v556_v47 = vmul.f32 0.00390625, %v545_v43  ;;  %v548_v50 = vpop.xlane.xlu1 %547 }
 0x152   : > { %v2882_v51 = vpop.eup %2881  ;;  %2891 = vrsqrt.f32 %v563_v44  ;;  %v557_v62 = vmul.f32 0.00390625, %v548_v50  ;;  %v684_v50 = vld [vmem:[#allocation9 + $0x110] sm:$0xff] }
 0x153   : > { %v575_v55 = vmul.f32 %v2882_v51, %v3647_v7  ;;  %v574_v56 = vmul.f32 %v2882_v51, %v3643_v4  ;;  %v564_v61 = vadd.f32 1e-06, %v556_v47  ;;  %v688_v51 = vld [vmem:[#allocation9 + $0x130] sm:$0xff] }
 0x154   : > { %v2884_v60 = vpop.eup %2883 }
 0x155   : > { %v3780_v63 = vmul.f32 %v3773_v48, %v575_v55  ;;  %v3783_v2 = vmul.f32 %v3775_v49, %v574_v56  ;;  %v579_v8 = vmul.f32 %v2884_v60, %v3672_v19  ;;  %2893 = vrsqrt.f32 %v564_v61  ;;  %v692_v61 = vld [vmem:[#allocation9 + $0x150] sm:$0xff] }
 0x156   : > { %v2886_v7 = vpop.eup %2885  ;;  %v565_v19 = vadd.f32 1e-06, %v557_v62  ;;  %v578_v17 = vmul.f32 %v2884_v60, %v3670_v18  ;;  %v677_v18 = vld [vmem:[#allocation9 + $0xd8] sm:$0xff]  ;;  %v2455_v60 = vpack.c.bf16 %v697_v54, %v693_v52  ;;  %v696_v62 = vld [vmem:[#allocation9 + $0x170] sm:$0xff] }
 0x157   : > { %842 = vmatprep.mubr.f32.mxu1 %v3780_v63  ;;  %1196 = vmatprep.mubr.f32.mxu0 %v3780_v63  ;;  %v577_v4 = vmul.f32 %v2886_v7, %v3661_v13  ;;  %v576_v10 = vmul.f32 %v2886_v7, %v3659_v12  ;;  %v3800_v12 = vmul.f32 %v3773_v48, %v579_v8  ;;  %v733_v52 = vld [vmem:[#allocation9 + $0x298] sm:$0xff] }
 0x158   : > { %v2888_v15 = vpop.eup %2887  ;;  %843 = vmatmul.mubr.f32.vlgmr.msra.gmra.mrb[0].mxu1 %v3783_v2  ;;  %1197 = vmatmul.mubr.f32.vlgmr.msra.gmra.mrb[0].mxu0 %v3783_v2  ;;  %2895 = vrsqrt.f32 %v565_v19  ;;  %v3806_v28 = vmul.f32 %v3775_v49, %v578_v17  ;;  %v2447_v34 = vpack.c.bf16 %v681_v27, %v677_v18  ;;  %v2463_v19 = vpack.c.bf16 %v713_v14, %v709_v11  ;;  %v708_v17 = vld [vmem:[#allocation9 + $0x1d0] sm:$0xff]  ;;  %v725_v27 = vld [vmem:[#allocation9 + $0x258] sm:$0xff] }
 0x159   : > { %2438 = vmatpush1.bf16.msra.mxu1 %v2437_v3  ;;  %v3794_v20 = vmul.f32 %v3773_v48, %v577_v4  ;;  %v3797_v13 = vmul.f32 %v3775_v49, %v576_v10  ;;  %v581_v21 = vmul.f32 %v2888_v15, %v3698_v32  ;;  %v580_v29 = vmul.f32 %v2888_v15, %v3686_v26  ;;  %v689_v26 = vld [vmem:[#allocation9 + $0x138] sm:$0xff]  ;;  %v700_v4 = vld [vmem:[#allocation9 + $0x190] sm:$0xff] }
 0x15a   : > { %2440 = vmatprep.subr.bf16.mxu1 %v2439_v9  ;;  %v2445_v32 = vpack.c.bf16 %v672_v25, %v668_v24  ;;  %v2451_v47 = vpack.c.bf16 %v689_v26, %v685_v37  ;;  %v701_v3 = vld [vmem:[#allocation9 + $0x198] sm:$0xff]  ;;  %v704_v10 = vld [vmem:[#allocation9 + $0x1b0] sm:$0xff]  ;;  %v1619_v26 = vld [vmem:[#allocation12 + $0x28] sm:$0xff] }
 0x15b   : > { %v2890_v22 = vpop.eup %2889  ;;  %848 = vmatprep.mubr.f32.mxu1 %v3794_v20  ;;  %1202 = vmatprep.mubr.f32.mxu0 %v3794_v20  ;;  %v3812_v30 = vmul.f32 %v3773_v48, %v581_v21  ;;  %v3819_v40 = vmul.f32 %v3775_v49, %v580_v29  ;;  %v2459_v9 = vpack.c.bf16 %v705_v5, %v701_v3  ;;  %v712_v21 = vld [vmem:[#allocation9 + $0x1f0] sm:$0xff]  ;;  %v729_v29 = vld [vmem:[#allocation9 + $0x278] sm:$0xff] }
 0x15c   : > { %849 = vmatmul.mubr.f32.gmra.mrb[2].mxu1 %v3797_v13  ;;  %v583_v31 = vmul.f32 %v2890_v22, %v3709_v39  ;;  %v2892_v33 = vpop.eup %2891  ;;  %1203 = vmatmul.mubr.f32.gmra.mrb[2].mxu0 %v3797_v13  ;;  %v582_v41 = vmul.f32 %v2890_v22, %v3707_v38  ;;  %v2449_v39 = vpack.c.bf16 %v680_v36, %v676_v35  ;;  %v717_v22 = vld [vmem:[#allocation9 + $0x218] sm:$0xff]  ;;  %v716_v25 = vld [vmem:[#allocation9 + $0x210] sm:$0xff] }
 0x15d   : > { %2442 = vmatpush1.bf16.msra.mxu1 %v2441_v16  ;;  %854 = vmatprep.mubr.f32.mxu1 %v3800_v12  ;;  %v585_v43 = vmul.f32 %v2892_v33, %v3720_v46  ;;  %v584_v55 = vmul.f32 %v2892_v33, %v3718_v45  ;;  %v2453_v46 = vpack.c.bf16 %v688_v51, %v684_v50  ;;  %v720_v18 = vld [vmem:[#allocation9 + $0x230] sm:$0xff]  ;;  %v1617_v33 = vld [vmem:[#allocation12 + $0x18] sm:$0xff]  ;;  %v1623_v51 = vld [vmem:[#allocation12 + $0x48] sm:$0xff] }
 0x15e   : > { %2444 = vmatprep.subr.bf16.mxu1 %v2443_v23  ;;  %1208 = vmatprep.mubr.f32.mxu0 %v3800_v12  ;;  %v3824_v42 = vmul.f32 %v3773_v48, %v583_v31  ;;  %v3831_v38 = vmul.f32 %v3775_v49, %v582_v41  ;;  %v721_v23 = vld [vmem:[#allocation9 + $0x238] sm:$0xff]  ;;  %v728_v31 = vld [vmem:[#allocation9 + $0x270] sm:$0xff]  ;;  %v2469_v35 = vpack.c.bf16 %v720_v18, %v716_v25 }
 0x15f   : > { %v2894_v44 = vpop.eup %2893  ;;  %v3836_v56 = vmul.f32 %v3773_v48, %v585_v43  ;;  %v3843_v45 = vmul.f32 %v3775_v49, %v584_v55  ;;  %v2467_v24 = vpack.c.bf16 %v721_v23, %v717_v22  ;;  %v1616_v37 = vld [vmem:[#allocation12 + $0x10] sm:$0xff]  ;;  %v1621_v41 = vld [vmem:[#allocation12 + $0x38] sm:$0xff] }
 0x160   : > { %855 = vmatmul.mubr.f32.gmra.mrb[4].mxu1 %v3806_v28  ;;  %1209 = vmatmul.mubr.f32.gmra.mrb[4].mxu0 %v3806_v28  ;;  %v587_v57 = vmul.f32 %v2894_v44, %v3746_v59  ;;  %v586_v6 = vmul.f32 %v2894_v44, %v3734_v53  ;;  %v2457_v59 = vpack.c.bf16 %v696_v62, %v692_v61  ;;  %v1620_v50 = vld [vmem:[#allocation12 + $0x30] sm:$0xff]  ;;  %v737_v54 = vld [vmem:[#allocation9 + $0x2b8] sm:$0xff]  ;;  %v1622_v61 = vld [vmem:[#allocation12 + $0x40] sm:$0xff] }
 0x161   : > { %2446 = vmatpush1.bf16.msra.mxu1 %v2445_v32  ;;  %860 = vmatprep.mubr.f32.mxu1 %v3812_v30  ;;  %v724_v32 = vld [vmem:[#allocation9 + $0x250] sm:$0xff]  ;;  %v2631_v44 = vpack.c.bf16 %v1621_v41, %v1619_v26  ;;  %v1625_v55 = vld [vmem:[#allocation12 + $0x58] sm:$0xff]  ;;  %v2475_v3 = vpack.c.bf16 %v737_v54, %v733_v52 }
 0x162   : > { %2448 = vmatprep.subr.bf16.mxu1 %v2447_v34  ;;  %1214 = vmatprep.mubr.f32.mxu0 %v3812_v30  ;;  %v2896_v58 = vpop.eup %2895  ;;  %v3848_v8 = vmul.f32 %v3773_v48, %v587_v57  ;;  %v3855_v53 = vmul.f32 %v3775_v49, %v586_v6  ;;  %v1614_v34 = vld [vmem:[#allocation12] sm:$0xff]  ;;  %v2473_v57 = vpack.c.bf16 %v728_v31, %v724_v32  ;;  %v1624_v62 = vld [vmem:[#allocation12 + $0x50] sm:$0xff]  ;;  %v1627_v6 = vld [vmem:[#allocation12 + $0x68] sm:$0xff] }
 0x163   : > { %v589_v7 = vmul.f32 %v2896_v58, %v3754_v1  ;;  %v588_v15 = vmul.f32 %v2896_v58, %v3752_v0  ;;  %v2461_v1 = vpack.c.bf16 %v704_v10, %v700_v4  ;;  %v2629_v43 = vpack.c.bf16 %v1616_v37, %v1614_v34  ;;  %v732_v58 = vld [vmem:[#allocation9 + $0x290] sm:$0xff]  ;;  %v1633_v22 = vld [vmem:[#allocation12 + $0x98] sm:$0xff] }
 0x164   : > { %861 = vmatmul.mubr.f32.gmra.mrb[6].mxu1 %v3819_v40  ;;  %1215 = vmatmul.mubr.f32.gmra.mrb[6].mxu0 %v3819_v40  ;;  %v736_v5 = vld [vmem:[#allocation9 + $0x2b0] sm:$0xff]  ;;  %v2637_v4 = vpack.c.bf16 %v1624_v62, %v1622_v61  ;;  %v749_v23 = vld [vmem:[#allocation9 + $0x318] sm:$0xff]  ;;  %v1638_v61 = vld [vmem:[#allocation12 + $0xc0] sm:$0xff] }
 0x165   : > { %2450 = vmatpush1.bf16.msra.mxu1 %v2449_v39  ;;  %866 = vmatprep.mubr.f32.mxu1 %v3824_v42  ;;  %v3860_v16 = vmul.f32 %v3773_v48, %v589_v7  ;;  %v3866_v0 = vmul.f32 %v3775_v49, %v588_v15  ;;  %v2465_v48 = vpack.c.bf16 %v712_v21, %v708_v17  ;;  %v1615_v49 = vld [vmem:[#allocation12 + $0x8] sm:$0xff]  ;;  %v741_v7 = vld [vmem:[#allocation9 + $0x2d8] sm:$0xff]  ;;  %v740_v11 = vld [vmem:[#allocation9 + $0x2d0] sm:$0xff] }
 0x166   : > { %2452 = vmatprep.subr.bf16.mxu1 %v2451_v47  ;;  %1220 = vmatprep.mubr.f32.mxu0 %v3824_v42  ;;  %v2627_v36 = vpack.c.bf16 %v1617_v33, %v1615_v49  ;;  %v2471_v39 = vpack.c.bf16 %v729_v29, %v725_v27  ;;  %v1618_v47 = vld [vmem:[#allocation12 + $0x20] sm:$0xff]  ;;  %v2477_v10 = vpack.c.bf16 %v736_v5, %v732_v58  ;;  %v744_v17 = vld [vmem:[#allocation9 + $0x2f0] sm:$0xff]  ;;  %v1631_v21 = vld [vmem:[#allocation12 + $0x88] sm:$0xff] }
 0x167   : > { %v1626_v15 = vld [vmem:[#allocation12 + $0x60] sm:$0xff]  ;;  %v2481_v25 = vpack.c.bf16 %v744_v17, %v740_v11  ;;  %v748_v18 = vld [vmem:[#allocation9 + $0x310] sm:$0xff]  ;;  %v2643_v27 = vpack.c.bf16 %v1633_v22, %v1631_v21  ;;  %v1635_v33 = vld [vmem:[#allocation12 + $0xa8] sm:$0xff] }
 0x168   : > { %867 = vmatmul.mubr.f32.gmra.mrb[8].mxu1 %v3831_v38  ;;  %1221 = vmatmul.mubr.f32.gmra.mrb[8].mxu0 %v3831_v38  ;;  %v1630_v29 = vld [vmem:[#allocation12 + $0x80] sm:$0xff]  ;;  %v1632_v32 = vld [vmem:[#allocation12 + $0x90] sm:$0xff]  ;;  %v1637_v34 = vld [vmem:[#allocation12 + $0xb8] sm:$0xff] }
 0x169   : > { %2454 = vmatpush1.bf16.msra.mxu1 %v2453_v46  ;;  %872 = vmatprep.mubr.f32.mxu1 %v3836_v56  ;;  %v2633_v46 = vpack.c.bf16 %v1620_v50, %v1618_v47  ;;  %v752_v49 = vld [vmem:[#allocation9 + $0x330] sm:$0xff]  ;;  %v2645_v37 = vpack.c.bf16 %v1632_v32, %v1630_v29  ;;  %v1641_v52 = vld [vmem:[#allocation12 + $0xd8] sm:$0xff] }
 0x16a   : > { %2456 = vmatprep.subr.bf16.mxu1 %v2455_v60  ;;  %1226 = vmatprep.mubr.f32.mxu0 %v3836_v56  ;;  %v2635_v60 = vpack.c.bf16 %v1625_v55, %v1623_v51  ;;  %v2485_v26 = vpack.c.bf16 %v752_v49, %v748_v18  ;;  %v756_v41 = vld [vmem:[#allocation9 + $0x350] sm:$0xff]  ;;  %v1639_v51 = vld [vmem:[#allocation12 + $0xc8] sm:$0xff]  ;;  %v765_v54 = vld [vmem:[#allocation9 + $0x398] sm:$0xff] }
 0x16b   : > { %2628 = vmatprep.subr.bf16.mxu0 %v2627_v36  ;;  %v761_v36 = vld [vmem:[#allocation9 + $0x378] sm:$0xff]  ;;  %v760_v50 = vld [vmem:[#allocation9 + $0x370] sm:$0xff] }
 0x16c   : > { %873 = vmatmul.mubr.f32.gmra.mrb[10].mxu1 %v3843_v45  ;;  %1227 = vmatmul.mubr.f32.gmra.mrb[10].mxu0 %v3843_v45  ;;  %v769_v55 = vld [vmem:[#allocation9 + $0x3b8] sm:$0xff]  ;;  %v764_v58 = vld [vmem:[#allocation9 + $0x390] sm:$0xff] }
 0x16d   : > { %2458 = vmatpush1.bf16.msra.mxu1 %v2457_v59  ;;  %878 = vmatprep.mubr.f32.mxu1 %v3848_v8  ;;  %v1629_v59 = vld [vmem:[#allocation12 + $0x78] sm:$0xff]  ;;  %v1640_v62 = vld [vmem:[#allocation12 + $0xd0] sm:$0xff] }
 0x16e   : > { %2460 = vmatprep.subr.bf16.mxu1 %v2459_v9  ;;  %1232 = vmatprep.mubr.f32.mxu0 %v3848_v8  ;;  %v745_v9 = vld [vmem:[#allocation9 + $0x2f8] sm:$0xff]  ;;  %v2639_v14 = vpack.c.bf16 %v1629_v59, %v1627_v6  ;;  %v768_v5 = vld [vmem:[#allocation9 + $0x3b0] sm:$0xff]  ;;  %v1643_v6 = vld [vmem:[#allocation12 + $0xe8] sm:$0xff] }
 0x16f   : > { %2630 = vmatpush1.bf16.msra.mxu0 %v2629_v43  ;;  %v1634_v43 = vld [vmem:[#allocation12 + $0xa0] sm:$0xff]  ;;  %v1645_v59 = vld [vmem:[#allocation12 + $0xf8] sm:$0xff]  ;;  %v776_v17 = vld [vmem:[#allocation9 + $0x3f0] sm:$0xff] }
 0x170   : > { %879 = vmatmul.mubr.f32.gmra.mrb[12].mxu1 %v3855_v53  ;;  %1233 = vmatmul.mubr.f32.gmra.mrb[12].mxu0 %v3855_v53  ;;  %v2655_v11 = vpack.c.bf16 %v1645_v59, %v1643_v6  ;;  %v1007_v21 = vld [vmem:[#allocation10 + $0x18] sm:$0xff]  ;;  %v1010_v18 = vld [vmem:[#allocation10 + $0x30] sm:$0xff] }
 0x171   : > { %2462 = vmatpush1.bf16.msra.mxu1 %v2461_v1  ;;  %884 = vmatprep.mubr.f32.mxu1 %v3860_v16  ;;  %v1628_v1 = vld [vmem:[#allocation12 + $0x70] sm:$0xff]  ;;  %v1011_v22 = vld [vmem:[#allocation10 + $0x38] sm:$0xff] }
 0x172   : > { %2464 = vmatprep.subr.bf16.mxu1 %v2463_v19  ;;  %1238 = vmatprep.mubr.f32.mxu0 %v3860_v16  ;;  %v2479_v19 = vpack.c.bf16 %v745_v9, %v741_v7  ;;  %v773_v7 = vld [vmem:[#allocation9 + $0x3d8] sm:$0xff]  ;;  %v1014_v49 = vld [vmem:[#allocation10 + $0x50] sm:$0xff] }
 0x173   : > { %2632 = vmatprep.subr.bf16.mxu0 %v2631_v44  ;;  %v1636_v44 = vld [vmem:[#allocation12 + $0xb0] sm:$0xff]  ;;  %v777_v9 = vld [vmem:[#allocation9 + $0x3f8] sm:$0xff] }
 0x174   : > { %885 = vmatmul.mubr.f32.gmra.mrb[14].mxu1 %v3866_v0  ;;  %1239 = vmatmul.mubr.f32.gmra.mrb[14].mxu0 %v3866_v0  ;;  %v1019_v29 = vld [vmem:[#allocation10 + $0x78] sm:$0xff]  ;;  %v1050_v6 = vld [vmem:[#allocation10 + $0x170] sm:$0xff] }
 0x175   : > { %2466 = vmatpush1.bf16.msra.mxu1 %v2465_v48  ;;  %955 = vmatprep.mubr.f32.mxu1 %v3780_v63  ;;  %v753_v48 = vld [vmem:[#allocation9 + $0x338] sm:$0xff] }
 0x176   : > { %2468 = vmatprep.subr.bf16.mxu1 %v2467_v24  ;;  %2634 = vmatpush1.bf16.msra.mxu0 %v2633_v46  ;;  %v2641_v24 = vpack.c.bf16 %v1628_v1, %v1626_v15  ;;  %v2483_v31 = vpack.c.bf16 %v753_v48, %v749_v23  ;;  %v2649_v46 = vpack.c.bf16 %v1636_v44, %v1634_v43  ;;  %v1644_v15 = vld [vmem:[#allocation12 + $0xf0] sm:$0xff]  ;;  %v1035_v43 = vld [vmem:[#allocation10 + $0xf8] sm:$0xff] }
 0x177   : > { %2636 = vmatprep.subr.bf16.mxu0 %v2635_v60  ;;  %v2651_v60 = vpack.c.bf16 %v1641_v52, %v1639_v51  ;;  %v2495_v1 = vpack.c.bf16 %v777_v9, %v773_v7  ;;  %v1034_v51 = vld [vmem:[#allocation10 + $0xf0] sm:$0xff]  ;;  %v1039_v52 = vld [vmem:[#allocation10 + $0x118] sm:$0xff] }
 0x178   : > { %v1055_v59 = vld [vmem:[#allocation10 + $0x198] sm:$0xff] }
 0x179   : > { %2470 = vmatpush1.bf16.msra.mxu1 %v2469_v35  ;;  %v757_v35 = vld [vmem:[#allocation9 + $0x358] sm:$0xff] }
 0x17a   : > { %2472 = vmatprep.subr.bf16.mxu1 %v2471_v39  ;;  %2638 = vmatpush1.bf16.msra.mxu0 %v2637_v4  ;;  %v2647_v39 = vpack.c.bf16 %v1637_v34, %v1635_v33  ;;  %v2487_v47 = vpack.c.bf16 %v761_v36, %v757_v35  ;;  %v2653_v4 = vpack.c.bf16 %v1640_v62, %v1638_v61  ;;  %v1018_v33 = vld [vmem:[#allocation10 + $0x70] sm:$0xff]  ;;  %v1023_v34 = vld [vmem:[#allocation10 + $0x98] sm:$0xff] }
 0x17b   : > { %2640 = vmatprep.subr.bf16.mxu0 %v2639_v14  ;;  %v1642_v14 = vld [vmem:[#allocation12 + $0xe0] sm:$0xff]  ;;  %v1027_v35 = vld [vmem:[#allocation10 + $0xb8] sm:$0xff]  ;;  %v2569_v36 = vpack.c.bf16 %v1018_v33, %v1014_v49 }
 0x17c   : > { %v2657_v23 = vpack.c.bf16 %v1644_v15, %v1642_v14  ;;  %v1051_v61 = vld [vmem:[#allocation10 + $0x178] sm:$0xff]  ;;  %v1647_v15 = vld [vmem:[#allocation12 + $0x108] sm:$0xff]  ;;  %v1650_v33 = vld [vmem:[#allocation12 + $0x120] sm:$0xff] }
 0x17d   : > { %2474 = vmatpush1.bf16.msra.mxu1 %v2473_v57  ;;  %v2489_v57 = vpack.c.bf16 %v760_v50, %v756_v41  ;;  %v1026_v41 = vld [vmem:[#allocation10 + $0xb0] sm:$0xff]  ;;  %v1059_v7 = vld [vmem:[#allocation10 + $0x1b8] sm:$0xff] }
 0x17e   : > { %2476 = vmatprep.subr.bf16.mxu1 %v2475_v3  ;;  %2642 = vmatpush1.bf16.msra.mxu0 %v2641_v24  ;;  %v2491_v3 = vpack.c.bf16 %v769_v55, %v765_v54  ;;  %v2563_v24 = vpack.c.bf16 %v1011_v22, %v1007_v21  ;;  %v1030_v50 = vld [vmem:[#allocation10 + $0xd0] sm:$0xff]  ;;  %v1043_v54 = vld [vmem:[#allocation10 + $0x138] sm:$0xff]  ;;  %v1646_v21 = vld [vmem:[#allocation12 + $0x100] sm:$0xff] }
 0x17f   : > { %2644 = vmatprep.subr.bf16.mxu0 %v2643_v27  ;;  %v1015_v27 = vld [vmem:[#allocation10 + $0x58] sm:$0xff]  ;;  %v2577_v55 = vpack.c.bf16 %v1034_v51, %v1030_v50  ;;  %v1648_v22 = vld [vmem:[#allocation12 + $0x110] sm:$0xff]  ;;  %v1654_v51 = vld [vmem:[#allocation12 + $0x140] sm:$0xff] }
 0x180   : > { %v1063_v14 = vld [vmem:[#allocation10 + $0x1d8] sm:$0xff] }
 0x181   : > { %2478 = vmatpush1.bf16.msra.mxu1 %v2477_v10  ;;  %v2493_v10 = vpack.c.bf16 %v768_v5, %v764_v58  ;;  %v1042_v58 = vld [vmem:[#allocation10 + $0x130] sm:$0xff] }
 0x182   : > { %2480 = vmatprep.subr.bf16.mxu1 %v2479_v19  ;;  %2646 = vmatpush1.bf16.msra.mxu0 %v2645_v37  ;;  %v772_v19 = vld [vmem:[#allocation9 + $0x3d0] sm:$0xff]  ;;  %v2571_v37 = vpack.c.bf16 %v1027_v35, %v1023_v34 }
 0x183   : > { %2648 = vmatprep.subr.bf16.mxu0 %v2647_v39  ;;  %v2497_v48 = vpack.c.bf16 %v776_v17, %v772_v19  ;;  %v1031_v39 = vld [vmem:[#allocation10 + $0xd8] sm:$0xff]  ;;  %v1046_v5 = vld [vmem:[#allocation10 + $0x150] sm:$0xff] }
 0x184   : > { %v2585_v9 = vpack.c.bf16 %v1050_v6, %v1046_v5  ;;  %v1067_v19 = vld [vmem:[#allocation10 + $0x1f8] sm:$0xff]  ;;  %v1652_v34 = vld [vmem:[#allocation12 + $0x130] sm:$0xff]  ;;  %v1658_v6 = vld [vmem:[#allocation12 + $0x160] sm:$0xff] }
 0x185   : > { %2482 = vmatpush1.bf16.msra.mxu1 %v2481_v25  ;;  %v1006_v25 = vld [vmem:[#allocation10 + $0x10] sm:$0xff]  ;;  %v2665_v35 = vpack.c.bf16 %v1652_v34, %v1650_v33 }
 0x186   : > { %2484 = vmatprep.subr.bf16.mxu1 %v2483_v31  ;;  %2650 = vmatpush1.bf16.msra.mxu0 %v2649_v46  ;;  %v2565_v32 = vpack.c.bf16 %v1010_v18, %v1006_v25  ;;  %v2567_v31 = vpack.c.bf16 %v1019_v29, %v1015_v27  ;;  %v2579_v46 = vpack.c.bf16 %v1043_v54, %v1039_v52  ;;  %v1066_v25 = vld [vmem:[#allocation10 + $0x1f0] sm:$0xff]  ;;  %v1071_v27 = vld [vmem:[#allocation10 + $0x218] sm:$0xff]  ;;  %v1651_v29 = vld [vmem:[#allocation12 + $0x128] sm:$0xff] }
 0x187   : > { %2652 = vmatprep.subr.bf16.mxu0 %v2651_v60  ;;  %v1047_v60 = vld [vmem:[#allocation10 + $0x158] sm:$0xff]  ;;  %v2591_v18 = vpack.c.bf16 %v1067_v19, %v1063_v14  ;;  %v1656_v52 = vld [vmem:[#allocation12 + $0x150] sm:$0xff]  ;;  %v1663_v14 = vld [vmem:[#allocation12 + $0x188] sm:$0xff] }
 0x188   : > { %v2669_v54 = vpack.c.bf16 %v1656_v52, %v1654_v51  ;;  %v1668_v33 = vld [vmem:[#allocation12 + $0x1b0] sm:$0xff] }
 0x189   : > { %2486 = vmatpush1.bf16.msra.mxu1 %v2485_v26  ;;  %v1022_v26 = vld [vmem:[#allocation10 + $0x90] sm:$0xff] }
 0x18a   : > { %2488 = vmatprep.subr.bf16.mxu1 %v2487_v47  ;;  %2654 = vmatpush1.bf16.msra.mxu0 %v2653_v4  ;;  %v2573_v44 = vpack.c.bf16 %v1026_v41, %v1022_v26  ;;  %v2575_v47 = vpack.c.bf16 %v1035_v43, %v1031_v39  ;;  %v1054_v4 = vld [vmem:[#allocation10 + $0x190] sm:$0xff]  ;;  %v1079_v39 = vld [vmem:[#allocation10 + $0x258] sm:$0xff]  ;;  %v1655_v43 = vld [vmem:[#allocation12 + $0x148] sm:$0xff] }
 0x18b   : > { %2656 = vmatprep.subr.bf16.mxu0 %v2655_v11  ;;  %v2587_v11 = vpack.c.bf16 %v1059_v7, %v1055_v59  ;;  %v1074_v26 = vld [vmem:[#allocation10 + $0x230] sm:$0xff] }
 0x18c   : > { %v1660_v59 = vld [vmem:[#allocation12 + $0x170] sm:$0xff] }
 0x18d   : > { %2490 = vmatpush1.bf16.msra.mxu1 %v2489_v57  ;;  %v1038_v57 = vld [vmem:[#allocation10 + $0x110] sm:$0xff]  ;;  %v2673_v7 = vpack.c.bf16 %v1660_v59, %v1658_v6 }
 0x18e   : > { %2492 = vmatprep.subr.bf16.mxu1 %v2491_v3  ;;  %2658 = vmatpush1.bf16.msra.mxu0 %v2657_v23  ;;  %v2581_v62 = vpack.c.bf16 %v1042_v58, %v1038_v57  ;;  %v2583_v3 = vpack.c.bf16 %v1051_v61, %v1047_v60  ;;  %v2661_v23 = vpack.c.bf16 %v1648_v22, %v1646_v21  ;;  %v1082_v57 = vld [vmem:[#allocation10 + $0x270] sm:$0xff]  ;;  %v1087_v60 = vld [vmem:[#allocation10 + $0x298] sm:$0xff]  ;;  %v1659_v61 = vld [vmem:[#allocation12 + $0x168] sm:$0xff] }
 0x18f   : > { %v1664_v21 = vld [vmem:[#allocation12 + $0x190] sm:$0xff] }
 0x190   : > { %v1672_v51 = vld [vmem:[#allocation12 + $0x1d0] sm:$0xff] }
 0x191   : > { %2494 = vmatpush1.bf16.msra.mxu1 %v2493_v10  ;;  %v1058_v10 = vld [vmem:[#allocation10 + $0x1b0] sm:$0xff] }
 0x192   : > { %2496 = vmatprep.subr.bf16.mxu1 %v2495_v1  ;;  %v1649_v1 = vld [vmem:[#allocation12 + $0x118] sm:$0xff]  ;;  %v1676_v6 = vld [vmem:[#allocation12 + $0x1f0] sm:$0xff] }
 0x193   : > { %v2659_v17 = vpack.c.bf16 %v1649_v1, %v1647_v15  ;;  %v1665_v15 = vld [vmem:[#allocation12 + $0x198] sm:$0xff] }
 0x194   : > { %v1099_v1 = vld [vmem:[#allocation10 + $0x2f8] sm:$0xff]  ;;  %v2675_v19 = vpack.c.bf16 %v1665_v15, %v1663_v14 }
 0x195   : > { %2498 = vmatpush1.bf16.msra.mxu1 %v2497_v48  ;;  %v2589_v48 = vpack.c.bf16 %v1058_v10, %v1054_v4  ;;  %2660 = vmatprep.subr.bf16.mxu0 %v2659_v17  ;;  %v1086_v4 = vld [vmem:[#allocation10 + $0x290] sm:$0xff]  ;;  %v1662_v17 = vld [vmem:[#allocation12 + $0x180] sm:$0xff] }
 0x196   : > { %2564 = vmatprep.subr.bf16.mxu1 %v2563_v24  ;;  %v1062_v24 = vld [vmem:[#allocation10 + $0x1d0] sm:$0xff]  ;;  %2662 = vmatpush1.bf16.msra.mxu0 %v2661_v23  ;;  %v2677_v22 = vpack.c.bf16 %v1664_v21, %v1662_v17 }
 0x197   : > { %v1090_v10 = vld [vmem:[#allocation10 + $0x2b0] sm:$0xff] }
 0x198   : > { %956 = vmatmul.mubr.f32.vlgmr.msra.gmra.mrb[16].mxu1 %v3783_v2  ;;  %v2605_v23 = vpack.c.bf16 %v1090_v10, %v1086_v4  ;;  %v1118_v4 = vld [vmem:[#allocation10 + $0x390] sm:$0xff] }
 0x199   : > { %961 = vmatprep.mubr.f32.mxu1 %v3794_v20  ;;  %2566 = vmatpush1.bf16.msra.mxu1 %v2565_v32  ;;  %v1653_v32 = vld [vmem:[#allocation12 + $0x138] sm:$0xff]  ;;  %v1122_v10 = vld [vmem:[#allocation10 + $0x3b0] sm:$0xff] }
 0x19a   : > { %2568 = vmatprep.subr.bf16.mxu1 %v2567_v31  ;;  %v1075_v31 = vld [vmem:[#allocation10 + $0x238] sm:$0xff]  ;;  %v2663_v49 = vpack.c.bf16 %v1653_v32, %v1651_v29  ;;  %v2621_v14 = vpack.c.bf16 %v1122_v10, %v1118_v4 }
 0x19b   : > { %v2595_v41 = vpack.c.bf16 %v1075_v31, %v1071_v27  ;;  %v1667_v27 = vld [vmem:[#allocation12 + $0x1a8] sm:$0xff]  ;;  %v1669_v29 = vld [vmem:[#allocation12 + $0x1b8] sm:$0xff] }
 0x19c   : > { %962 = vmatmul.mubr.f32.gmra.mrb[18].mxu1 %v3797_v13  ;;  %2664 = vmatprep.subr.bf16.mxu0 %v2663_v49  ;;  %v1107_v32 = vld [vmem:[#allocation10 + $0x338] sm:$0xff]  ;;  %v2679_v31 = vpack.c.bf16 %v1669_v29, %v1667_v27  ;;  %v1666_v49 = vld [vmem:[#allocation12 + $0x1a0] sm:$0xff] }
 0x19d   : > { %967 = vmatprep.mubr.f32.mxu1 %v3800_v12  ;;  %2570 = vmatpush1.bf16.msra.mxu1 %v2569_v36  ;;  %v2593_v36 = vpack.c.bf16 %v1066_v25, %v1062_v24  ;;  %v1098_v24 = vld [vmem:[#allocation10 + $0x2f0] sm:$0xff]  ;;  %v2681_v34 = vpack.c.bf16 %v1668_v33, %v1666_v49 }
 0x19e   : > { %2572 = vmatprep.subr.bf16.mxu1 %v2571_v37  ;;  %v1070_v37 = vld [vmem:[#allocation10 + $0x210] sm:$0xff]  ;;  %2666 = vmatpush1.bf16.msra.mxu0 %v2665_v35 }
 0x1a0   : > { %968 = vmatmul.mubr.f32.gmra.mrb[20].mxu1 %v3806_v28 }
 0x1a1   : > { %973 = vmatprep.mubr.f32.mxu1 %v3812_v30  ;;  %2574 = vmatpush1.bf16.msra.mxu1 %v2573_v44  ;;  %v1657_v44 = vld [vmem:[#allocation12 + $0x158] sm:$0xff] }
 0x1a2   : > { %2576 = vmatprep.subr.bf16.mxu1 %v2575_v47  ;;  %v1083_v47 = vld [vmem:[#allocation10 + $0x278] sm:$0xff]  ;;  %v2667_v50 = vpack.c.bf16 %v1657_v44, %v1655_v43 }
 0x1a3   : > { %v2599_v58 = vpack.c.bf16 %v1083_v47, %v1079_v39  ;;  %v1671_v39 = vld [vmem:[#allocation12 + $0x1c8] sm:$0xff]  ;;  %v1673_v43 = vld [vmem:[#allocation12 + $0x1d8] sm:$0xff] }
 0x1a4   : > { %974 = vmatmul.mubr.f32.gmra.mrb[22].mxu1 %v3819_v40  ;;  %2668 = vmatprep.subr.bf16.mxu0 %v2667_v50  ;;  %v1115_v44 = vld [vmem:[#allocation10 + $0x378] sm:$0xff]  ;;  %v2683_v47 = vpack.c.bf16 %v1673_v43, %v1671_v39  ;;  %v1670_v50 = vld [vmem:[#allocation12 + $0x1c0] sm:$0xff] }
 0x1a5   : > { %979 = vmatprep.mubr.f32.mxu1 %v3824_v42  ;;  %2578 = vmatpush1.bf16.msra.mxu1 %v2577_v55  ;;  %v2597_v55 = vpack.c.bf16 %v1074_v26, %v1070_v37  ;;  %v1106_v37 = vld [vmem:[#allocation10 + $0x330] sm:$0xff]  ;;  %v2685_v52 = vpack.c.bf16 %v1672_v51, %v1670_v50 }
 0x1a6   : > { %2580 = vmatprep.subr.bf16.mxu1 %v2579_v46  ;;  %v1078_v46 = vld [vmem:[#allocation10 + $0x250] sm:$0xff]  ;;  %2670 = vmatpush1.bf16.msra.mxu0 %v2669_v54 }
 0x1a8   : > { %980 = vmatmul.mubr.f32.gmra.mrb[24].mxu1 %v3831_v38 }
 0x1a9   : > { %985 = vmatprep.mubr.f32.mxu1 %v3836_v56  ;;  %2582 = vmatpush1.bf16.msra.mxu1 %v2581_v62  ;;  %v1661_v62 = vld [vmem:[#allocation12 + $0x178] sm:$0xff] }
 0x1aa   : > { %2584 = vmatprep.subr.bf16.mxu1 %v2583_v3  ;;  %v1091_v3 = vld [vmem:[#allocation10 + $0x2b8] sm:$0xff]  ;;  %v2671_v5 = vpack.c.bf16 %v1661_v62, %v1659_v61 }
 0x1ab   : > { %v1677_v61 = vld [vmem:[#allocation12 + $0x1f8] sm:$0xff] }
 0x1ac   : > { %986 = vmatmul.mubr.f32.gmra.mrb[26].mxu1 %v3843_v45  ;;  %2672 = vmatprep.subr.bf16.mxu0 %v2671_v5  ;;  %v1123_v62 = vld [vmem:[#allocation10 + $0x3b8] sm:$0xff]  ;;  %v1674_v5 = vld [vmem:[#allocation12 + $0x1e0] sm:$0xff] }
 0x1ad   : > { %991 = vmatprep.mubr.f32.mxu1 %v3848_v8  ;;  %2586 = vmatpush1.bf16.msra.mxu1 %v2585_v9  ;;  %v2601_v9 = vpack.c.bf16 %v1082_v57, %v1078_v46  ;;  %v1114_v46 = vld [vmem:[#allocation10 + $0x370] sm:$0xff]  ;;  %v2689_v59 = vpack.c.bf16 %v1676_v6, %v1674_v5 }
 0x1ae   : > { %2588 = vmatprep.subr.bf16.mxu1 %v2587_v11  ;;  %v1095_v11 = vld [vmem:[#allocation10 + $0x2d8] sm:$0xff]  ;;  %2674 = vmatpush1.bf16.msra.mxu0 %v2673_v7 }
 0x1af   : > { %2676 = vmatprep.subr.bf16.mxu0 %v2675_v19  ;;  %v2607_v25 = vpack.c.bf16 %v1099_v1, %v1095_v11  ;;  %v1131_v11 = vld [vmem:[#allocation10 + $0x3f8] sm:$0xff]  ;;  %v1126_v1 = vld [vmem:[#allocation10 + $0x3d0] sm:$0xff] }
 0x1b0   : > { %992 = vmatmul.mubr.f32.gmra.mrb[28].mxu1 %v3855_v53  ;;  %v1130_v19 = vld [vmem:[#allocation10 + $0x3f0] sm:$0xff] }
 0x1b1   : > { %997 = vmatprep.mubr.f32.mxu1 %v3860_v16  ;;  %2590 = vmatpush1.bf16.msra.mxu1 %v2589_v48  ;;  %v1094_v48 = vld [vmem:[#allocation10 + $0x2d0] sm:$0xff]  ;;  %v2625_v17 = vpack.c.bf16 %v1130_v19, %v1126_v1  ;;  %v1678_v19 = vld [vmem:[#allocation12 + $0x200] sm:$0xff] }
 0x1b2   : > { %2592 = vmatprep.subr.bf16.mxu1 %v2591_v18  ;;  %v1103_v18 = vld [vmem:[#allocation10 + $0x318] sm:$0xff]  ;;  %2678 = vmatpush1.bf16.msra.mxu0 %v2677_v22  ;;  %v2609_v35 = vpack.c.bf16 %v1098_v24, %v1094_v48 }
 0x1b3   : > { %2680 = vmatprep.subr.bf16.mxu0 %v2679_v31  ;;  %v2611_v26 = vpack.c.bf16 %v1107_v32, %v1103_v18 }
 0x1b4   : > { %998 = vmatmul.mubr.f32.gmra.mrb[30].mxu1 %v3866_v0 }
 0x1b5   : > { %2594 = vmatpush1.bf16.msra.mxu1 %v2593_v36  ;;  %1309 = vmatprep.mubr.f32.mxu1 %v3780_v63  ;;  %v2603_v63 = vpack.c.bf16 %v1091_v3, %v1087_v60  ;;  %v1102_v36 = vld [vmem:[#allocation10 + $0x310] sm:$0xff]  ;;  %v1675_v60 = vld [vmem:[#allocation12 + $0x1e8] sm:$0xff] }
 0x1b6   : > { %2596 = vmatprep.subr.bf16.mxu1 %v2595_v41  ;;  %v1111_v41 = vld [vmem:[#allocation10 + $0x358] sm:$0xff]  ;;  %2682 = vmatpush1.bf16.msra.mxu0 %v2681_v34  ;;  %v2613_v54 = vpack.c.bf16 %v1106_v37, %v1102_v36  ;;  %v2687_v3 = vpack.c.bf16 %v1677_v61, %v1675_v60 }
 0x1b7   : > { %2684 = vmatprep.subr.bf16.mxu0 %v2683_v47  ;;  %v2615_v57 = vpack.c.bf16 %v1115_v44, %v1111_v41 }
 0x1b9   : > { %2598 = vmatpush1.bf16.msra.mxu1 %v2597_v55  ;;  %v1110_v55 = vld [vmem:[#allocation10 + $0x350] sm:$0xff] }
 0x1ba   : > { %2600 = vmatprep.subr.bf16.mxu1 %v2599_v58  ;;  %v1119_v58 = vld [vmem:[#allocation10 + $0x398] sm:$0xff]  ;;  %2686 = vmatpush1.bf16.msra.mxu0 %v2685_v52  ;;  %v2617_v7 = vpack.c.bf16 %v1114_v46, %v1110_v55 }
 0x1bb   : > { %2688 = vmatprep.subr.bf16.mxu0 %v2687_v3 }
 0x1bd   : > { %2602 = vmatpush1.bf16.msra.mxu1 %v2601_v9  ;;  %v2619_v9 = vpack.c.bf16 %v1123_v62, %v1119_v58 }
 0x1be   : > { %2604 = vmatprep.subr.bf16.mxu1 %v2603_v63  ;;  %v1127_v63 = vld [vmem:[#allocation10 + $0x3d8] sm:$0xff]  ;;  %2690 = vmatpush1.bf16.msra.mxu0 %v2689_v59 }
 0x1bf   : > { %v2623_v15 = vpack.c.bf16 %v1131_v11, %v1127_v63 }
 0x1c1   : > { %2606 = vmatpush1.bf16.msra.mxu1 %v2605_v23 }
 0x1c2   : > { %2608 = vmatprep.subr.bf16.mxu1 %v2607_v25 }
 0x1c5   : > { %2610 = vmatpush1.bf16.msra.mxu1 %v2609_v35 }
 0x1c6   : > { %2612 = vmatprep.subr.bf16.mxu1 %v2611_v26 }
 0x1c9   : > { %2614 = vmatpush1.bf16.msra.mxu1 %v2613_v54 }
 0x1ca   : > { %2616 = vmatprep.subr.bf16.mxu1 %v2615_v57 }
 0x1cd   : > { %2618 = vmatpush1.bf16.msra.mxu1 %v2617_v7 }
 0x1ce   : > { %2620 = vmatprep.subr.bf16.mxu1 %v2619_v9 }
 0x1d1   : > { %2622 = vmatpush1.bf16.msra.mxu1 %v2621_v14 }
 0x1d2   : > { %2624 = vmatprep.subr.bf16.mxu1 %v2623_v15 }
 0x1d5   : > { %2626 = vmatpush1.bf16.msra.mxu1 %v2625_v17  ;;  %v1680_v17 = vld [vmem:[#allocation12 + $0x210] sm:$0xff] }
 0x1d8   : > { %1310 = vmatmul.mubr.f32.vlgmr.msra.gmra.mrb[32].mxu1 %v3783_v2  ;;  %v1679_v2 = vld [vmem:[#allocation12 + $0x208] sm:$0xff] }
 0x1d9   : > { %1315 = vmatprep.mubr.f32.mxu1 %v3794_v20  ;;  %v1681_v20 = vld [vmem:[#allocation12 + $0x218] sm:$0xff] }
 0x1dc   : > { %1316 = vmatmul.mubr.f32.gmra.mrb[34].mxu1 %v3797_v13  ;;  %v2691_v13 = vpack.c.bf16 %v1681_v20, %v1679_v2 }
 0x1dd   : > { %1321 = vmatprep.mubr.f32.mxu1 %v3800_v12 }
 0x1de   : > { %2692 = vmatprep.subr.bf16.mxu0 %v2691_v13 }
 0x1e0   : > { %1322 = vmatmul.mubr.f32.gmra.mrb[36].mxu1 %v3806_v28 }
 0x1e1   : > { %1327 = vmatprep.mubr.f32.mxu1 %v3812_v30 }
 0x1e4   : > { %1328 = vmatmul.mubr.f32.gmra.mrb[38].mxu1 %v3819_v40 }
 0x1e5   : > { %1333 = vmatprep.mubr.f32.mxu1 %v3824_v42 }
 0x1e8   : > { %1334 = vmatmul.mubr.f32.gmra.mrb[40].mxu1 %v3831_v38 }
 0x1e9   : > { %1339 = vmatprep.mubr.f32.mxu1 %v3836_v56 }
 0x1ec   : > { %1340 = vmatmul.mubr.f32.gmra.mrb[42].mxu1 %v3843_v45 }
 0x1ed   : > { %1345 = vmatprep.mubr.f32.mxu1 %v3848_v8 }
 0x1f0   : > { %1346 = vmatmul.mubr.f32.gmra.mrb[44].mxu1 %v3855_v53 }
 0x1f1   : > { %1351 = vmatprep.mubr.f32.mxu1 %v3860_v16 }
 0x1f4   : > { %1352 = vmatmul.mubr.f32.gmra.mrb[46].mxu1 %v3866_v0 }
 0x22b   : > { %v3905_v12 = vpop.f32.mrb[0].mxu1  ;;  %v3907_v28 = vpop.f32.mrb[0].mxu0 }
 0x22c   : > { %v2321_v30 = vmul.f32 -1.442695, %v3905_v12  ;;  %v3910_v40 = vpop.f32.mrb[1].mxu1  ;;  %v3912_v42 = vpop.f32.mrb[1].mxu0 }
 0x22d   : > { %v2322_v38 = vmul.f32 -1.442695, %v3910_v40 }
 0x22e   : > { %2897 = vpow2.f32 %v2321_v30  ;;  %v1683_v30 = vld [vmem:[#allocation12 + $0x228] sm:$0xff] }
 0x22f   : > { %2899 = vpow2.f32 %v2322_v38  ;;  %v3915_v56 = vpop.f32.mrb[2].mxu1  ;;  %v3921_v16 = vpop.f32.mrb[2].mxu0  ;;  %v1685_v38 = vld [vmem:[#allocation12 + $0x238] sm:$0xff] }
 0x230   : > { %v2325_v45 = vmul.f32 -1.442695, %v3915_v56  ;;  %v3918_v8 = vpop.f32.mrb[3].mxu1  ;;  %v3923_v0 = vpop.f32.mrb[3].mxu0 }
 0x231   : > { %v2326_v53 = vmul.f32 -1.442695, %v3918_v8 }
 0x232   : > { %2901 = vpow2.f32 %v2325_v45 }
 0x233   : > { %2903 = vpow2.f32 %v2326_v53  ;;  %v3925_v21 = vpop.f32.mrb[4].mxu1  ;;  %v3931_v24 = vpop.f32.mrb[4].mxu0 }
 0x234   : > { %v2329_v22 = vmul.f32 -1.442695, %v3925_v21  ;;  %v3928_v23 = vpop.f32.mrb[5].mxu1  ;;  %v3933_v25 = vpop.f32.mrb[5].mxu0 }
 0x235   : > { %v2330_v48 = vmul.f32 -1.442695, %v3928_v23 }
 0x236   : > { %2905 = vpow2.f32 %v2329_v22 }
 0x237   : > { %2907 = vpow2.f32 %v2330_v48  ;;  %v3935_v18 = vpop.f32.mrb[6].mxu1  ;;  %v3941_v34 = vpop.f32.mrb[6].mxu0 }
 0x238   : > { %v2898_v27 = vpop.eup %2897  ;;  %v2333_v29 = vmul.f32 -1.442695, %v3935_v18  ;;  %v3938_v32 = vpop.f32.mrb[7].mxu1 }
 0x239   : > { %v2900_v31 = vpop.eup %2899  ;;  %v1454_v49 = vadd.f32 1.0, %v2898_v27  ;;  %v2334_v33 = vmul.f32 -1.442695, %v3938_v32  ;;  %v3943_v36 = vpop.f32.mrb[7].mxu0 }
 0x23a   : > { %v1455_v35 = vadd.f32 1.0, %v2900_v31  ;;  %2909 = vpow2.f32 %v2333_v29 }
 0x23b   : > { %2911 = vrcp.f32 %v1454_v49  ;;  %v3945_v37 = vpop.f32.mrb[8].mxu1  ;;  %v3951_v50 = vpop.f32.mrb[8].mxu0 }
 0x23c   : > { %v2902_v26 = vpop.eup %2901  ;;  %2913 = vrcp.f32 %v1455_v35  ;;  %v2337_v41 = vmul.f32 -1.442695, %v3945_v37  ;;  %v3948_v39 = vpop.f32.mrb[9].mxu1 }
 0x23d   : > { %v2904_v43 = vpop.eup %2903  ;;  %v1458_v44 = vadd.f32 1.0, %v2902_v26  ;;  %2915 = vpow2.f32 %v2334_v33  ;;  %v2338_v47 = vmul.f32 -1.442695, %v3948_v39  ;;  %v3953_v52 = vpop.f32.mrb[9].mxu0  ;;  %v2693_v33 = vpack.c.bf16 %v1680_v17, %v1678_v19  ;;  %v1693_v19 = vld [vmem:[#allocation12 + $0x278] sm:$0xff] }
 0x23e   : > { %v1459_v51 = vadd.f32 1.0, %v2904_v43  ;;  %2917 = vpow2.f32 %v2337_v41  ;;  %v2695_v41 = vpack.c.bf16 %v1685_v38, %v1683_v30  ;;  %v1682_v43 = vld [vmem:[#allocation12 + $0x220] sm:$0xff] }
 0x23f   : > { %2919 = vrcp.f32 %v1458_v44  ;;  %v3955_v54 = vpop.f32.mrb[10].mxu1  ;;  %v3961_v62 = vpop.f32.mrb[10].mxu0  ;;  %v1684_v44 = vld [vmem:[#allocation12 + $0x230] sm:$0xff] }
 0x240   : > { %v2906_v55 = vpop.eup %2905  ;;  %2921 = vrcp.f32 %v1459_v51  ;;  %v2341_v46 = vmul.f32 -1.442695, %v3955_v54  ;;  %v3958_v57 = vpop.f32.mrb[11].mxu1 }
 0x241   : > { %v2908_v58 = vpop.eup %2907  ;;  %v1462_v60 = vadd.f32 1.0, %v2906_v55  ;;  %2923 = vpow2.f32 %v2338_v47  ;;  %v2342_v61 = vmul.f32 -1.442695, %v3958_v57  ;;  %v3963_v5 = vpop.f32.mrb[11].mxu0  ;;  %v1689_v55 = vld [vmem:[#allocation12 + $0x258] sm:$0xff] }
 0x242   : > { %v1463_v3 = vadd.f32 1.0, %v2908_v58  ;;  %2925 = vpow2.f32 %v2341_v46 }
 0x243   : > { %2927 = vrcp.f32 %v1462_v60  ;;  %v3965_v6 = vpop.f32.mrb[12].mxu1  ;;  %v3971_v11 = vpop.f32.mrb[12].mxu0 }
 0x244   : > { %v2910_v59 = vpop.eup %2909  ;;  %2929 = vrcp.f32 %v1463_v3  ;;  %v2345_v7 = vmul.f32 -1.442695, %v3965_v6  ;;  %v3968_v9 = vpop.f32.mrb[13].mxu1 }
 0x245   : > { %v2912_v4 = vpop.eup %2911  ;;  %v1466_v10 = vadd.f32 1.0, %v2910_v59  ;;  %2931 = vpow2.f32 %v2342_v61  ;;  %v2346_v63 = vmul.f32 -1.442695, %v3968_v9  ;;  %v3974_v1 = vpop.f32.mrb[13].mxu0  ;;  %v2697_v59 = vpack.c.bf16 %v1684_v44, %v1682_v43  ;;  %v1694_v43 = vld [vmem:[#allocation12 + $0x280] sm:$0xff]  ;;  %v1696_v44 = vld [vmem:[#allocation12 + $0x290] sm:$0xff] }
 0x246   : > { %v2914_v14 = vpop.eup %2913  ;;  %v1550_v15 = vmul.f32 %v2912_v4, %v3905_v12  ;;  %2933 = vpow2.f32 %v2345_v7 }
 0x247   : > { %v2916_v2 = vpop.eup %2915  ;;  %v1551_v20 = vmul.f32 %v2914_v14, %v3910_v40  ;;  %2935 = vrcp.f32 %v1466_v10  ;;  %v3977_v13 = vpop.f32.mrb[14].mxu1  ;;  %v1686_v10 = vld [vmem:[#allocation12 + $0x240] sm:$0xff] }
 0x248   : > { %v2918_v45 = vpop.eup %2917  ;;  %v1582_v53 = vmul.f32 %v1550_v15, %v3907_v28  ;;  %v1467_v22 = vadd.f32 1.0, %v2916_v2  ;;  %2937 = vpow2.f32 %v2346_v63  ;;  %v2349_v12 = vmul.f32 -1.442695, %v3977_v13  ;;  %v3981_v48 = vpop.f32.mrb[15].mxu1  ;;  %v1688_v63 = vld [vmem:[#allocation12 + $0x250] sm:$0xff] }
 0x249   : > { %v2920_v27 = vpop.eup %2919  ;;  %v1583_v29 = vmul.f32 %v1551_v20, %v3912_v42  ;;  %v1470_v31 = vadd.f32 1.0, %v2918_v45  ;;  %v2350_v40 = vmul.f32 -1.442695, %v3981_v48  ;;  %v3985_v49 = vpop.f32.mrb[14].mxu0  ;;  %v1687_v42 = vld [vmem:[#allocation12 + $0x248] sm:$0xff]  ;;  %v2701_v38 = vpack.c.bf16 %v1688_v63, %v1686_v10 }
 0x24a   : > { %v2922_v35 = vpop.eup %2921  ;;  %v1554_v26 = vmul.f32 %v2920_v27, %v3915_v56  ;;  %2939 = vrcp.f32 %v1467_v22  ;;  %v3988_v28 = vpop.f32.mrb[15].mxu0  ;;  %v2699_v4 = vpack.c.bf16 %v1689_v55, %v1687_v42  ;;  %v1690_v22 = vld [vmem:[#allocation12 + $0x260] sm:$0xff]  ;;  %v1699_v55 = vld [vmem:[#allocation12 + $0x2a8] sm:$0xff] }
 0x24b   : > { %v2924_v47 = vpop.eup %2923  ;;  %v1555_v51 = vmul.f32 %v2922_v35, %v3918_v8  ;;  %2941 = vrcp.f32 %v1470_v31  ;;  %1806 = vmatprep.mubr.f32.mxu0 %v1583_v29  ;;  %v1695_v29 = vld [vmem:[#allocation12 + $0x288] sm:$0xff] }
 0x24c   : > { %v2926_v46 = vpop.eup %2925  ;;  %v1471_v58 = vadd.f32 1.0, %v2924_v47  ;;  %2943 = vpow2.f32 %v2349_v12  ;;  %v1586_v60 = vmul.f32 %v1554_v26, %v3921_v16  ;;  %1807 = vmatmul.mubr.f32.vlgmr.msra.gmra.mrb[16].mxu0 %v1582_v53  ;;  %v1691_v16 = vld [vmem:[#allocation12 + $0x268] sm:$0xff]  ;;  %v1692_v12 = vld [vmem:[#allocation12 + $0x270] sm:$0xff] }
 0x24d   : > { %v2928_v56 = vpop.eup %2927  ;;  %v1474_v61 = vadd.f32 1.0, %v2926_v46  ;;  %2945 = vpow2.f32 %v2350_v40  ;;  %v1587_v3 = vmul.f32 %v1555_v51, %v3923_v0  ;;  %2694 = vmatpush1.bf16.msra.mxu0 %v2693_v33 }
 0x24e   : > { %v2930_v7 = vpop.eup %2929  ;;  %v1558_v8 = vmul.f32 %v2928_v56, %v3925_v21  ;;  %2947 = vrcp.f32 %v1471_v58  ;;  %2696 = vmatprep.subr.bf16.mxu0 %v2695_v41 }
 0x24f   : > { %v2932_v14 = vpop.eup %2931  ;;  %v1559_v15 = vmul.f32 %v2930_v7, %v3928_v23  ;;  %2949 = vrcp.f32 %v1474_v61  ;;  %1812 = vmatprep.mubr.f32.mxu0 %v1587_v3  ;;  %v2703_v23 = vpack.c.bf16 %v1693_v19, %v1691_v16  ;;  %v1702_v16 = vld [vmem:[#allocation12 + $0x2c0] sm:$0xff]  ;;  %v1704_v19 = vld [vmem:[#allocation12 + $0x2d0] sm:$0xff] }
 0x250   : > { %v2934_v17 = vpop.eup %2933  ;;  %v1475_v2 = vadd.f32 1.0, %v2932_v14  ;;  %v1590_v0 = vmul.f32 %v1558_v8, %v3931_v24  ;;  %1813 = vmatmul.mubr.f32.gmra.mrb[18].mxu0 %v1586_v60  ;;  %v1697_v24 = vld [vmem:[#allocation12 + $0x298] sm:$0xff]  ;;  %v1703_v8 = vld [vmem:[#allocation12 + $0x2c8] sm:$0xff] }
 0x251   : > { %v2936_v20 = vpop.eup %2935  ;;  %v1478_v30 = vadd.f32 1.0, %v2934_v17  ;;  %v1591_v21 = vmul.f32 %v1559_v15, %v3933_v25  ;;  %2698 = vmatpush1.bf16.msra.mxu0 %v2697_v59  ;;  %v2707_v41 = vpack.c.bf16 %v1697_v24, %v1695_v29  ;;  %v1700_v59 = vld [vmem:[#allocation12 + $0x2b0] sm:$0xff] }
 0x252   : > { %v2938_v45 = vpop.eup %2937  ;;  %v1562_v53 = vmul.f32 %v2936_v20, %v3935_v18  ;;  %2951 = vrcp.f32 %v1475_v2  ;;  %2700 = vmatprep.subr.bf16.mxu0 %v2699_v4  ;;  %v2705_v18 = vpack.c.bf16 %v1692_v12, %v1690_v22  ;;  %v1705_v4 = vld [vmem:[#allocation12 + $0x2d8] sm:$0xff]  ;;  %v1707_v2 = vld [vmem:[#allocation12 + $0x2e8] sm:$0xff]  ;;  %v1712_v29 = vld [vmem:[#allocation12 + $0x310] sm:$0xff] }
 0x253   : > { %2953 = vrcp.f32 %v1478_v30  ;;  %v1479_v27 = vadd.f32 1.0, %v2938_v45  ;;  %1818 = vmatprep.mubr.f32.mxu0 %v1591_v21  ;;  %v2715_v15 = vpack.c.bf16 %v1705_v4, %v1703_v8  ;;  %v1706_v21 = vld [vmem:[#allocation12 + $0x2e0] sm:$0xff]  ;;  %v1731_v4 = vld [vmem:[#allocation12 + $0x3a8] sm:$0xff] }
 0x254   : > { %v2940_v31 = vpop.eup %2939  ;;  %v1594_v40 = vmul.f32 %v1562_v53, %v3941_v34  ;;  %1819 = vmatmul.mubr.f32.gmra.mrb[20].mxu0 %v1590_v0  ;;  %v1701_v34 = vld [vmem:[#allocation12 + $0x2b8] sm:$0xff]  ;;  %v1711_v53 = vld [vmem:[#allocation12 + $0x308] sm:$0xff] }
 0x255   : > { %v2942_v25 = vpop.eup %2941  ;;  %v1563_v33 = vmul.f32 %v2940_v31, %v3938_v32  ;;  %2955 = vrcp.f32 %v1479_v27  ;;  %2702 = vmatpush1.bf16.msra.mxu0 %v2701_v38  ;;  %v2711_v3 = vpack.c.bf16 %v1701_v34, %v1699_v55  ;;  %v1709_v0 = vld [vmem:[#allocation12 + $0x2f8] sm:$0xff]  ;;  %v1708_v38 = vld [vmem:[#allocation12 + $0x2f0] sm:$0xff]  ;;  %v1710_v27 = vld [vmem:[#allocation12 + $0x300] sm:$0xff] }
 0x256   : > { %v2944_v35 = vpop.eup %2943  ;;  %v1566_v26 = vmul.f32 %v2942_v25, %v3945_v37  ;;  %2704 = vmatprep.subr.bf16.mxu0 %v2703_v23  ;;  %v2709_v37 = vpack.c.bf16 %v1696_v44, %v1694_v43  ;;  %v1713_v23 = vld [vmem:[#allocation12 + $0x318] sm:$0xff]  ;;  %v1715_v31 = vld [vmem:[#allocation12 + $0x328] sm:$0xff]  ;;  %v2725_v25 = vpack.c.bf16 %v1712_v29, %v1710_v27  ;;  %v1718_v43 = vld [vmem:[#allocation12 + $0x340] sm:$0xff] }
 0x257   : > { %v2946_v47 = vpop.eup %2945  ;;  %v1482_v51 = vadd.f32 1.0, %v2944_v35  ;;  %v1595_v42 = vmul.f32 %v1563_v33, %v3943_v36  ;;  %v1698_v36 = vld [vmem:[#allocation12 + $0x2a0] sm:$0xff]  ;;  %v1716_v33 = vld [vmem:[#allocation12 + $0x330] sm:$0xff]  ;;  %v1721_v35 = vld [vmem:[#allocation12 + $0x358] sm:$0xff] }
 0x258   : > { %v2948_v46 = vpop.eup %2947  ;;  %v1483_v58 = vadd.f32 1.0, %v2946_v47  ;;  %v1598_v32 = vmul.f32 %v1566_v26, %v3951_v50  ;;  %v2713_v14 = vpack.c.bf16 %v1700_v59, %v1698_v36  ;;  %v1720_v44 = vld [vmem:[#allocation12 + $0x350] sm:$0xff]  ;;  %v1726_v59 = vld [vmem:[#allocation12 + $0x380] sm:$0xff] }
 0x259   : > { %v2950_v60 = vpop.eup %2949  ;;  %v1567_v56 = vmul.f32 %v2948_v46, %v3948_v39  ;;  %2957 = vrcp.f32 %v1482_v51  ;;  %1824 = vmatprep.mubr.f32.mxu0 %v1595_v42  ;;  %2706 = vmatpush1.bf16.msra.mxu0 %v2705_v18  ;;  %v1723_v51 = vld [vmem:[#allocation12 + $0x368] sm:$0xff]  ;;  %v1725_v42 = vld [vmem:[#allocation12 + $0x378] sm:$0xff]  ;;  %v2733_v34 = vpack.c.bf16 %v1720_v44, %v1718_v43 }
 0x25a   : > { %v1570_v61 = vmul.f32 %v2950_v60, %v3955_v54  ;;  %2959 = vrcp.f32 %v1483_v58  ;;  %1825 = vmatmul.mubr.f32.gmra.mrb[22].mxu0 %v1594_v40  ;;  %2708 = vmatprep.subr.bf16.mxu0 %v2707_v41  ;;  %v1717_v40 = vld [vmem:[#allocation12 + $0x338] sm:$0xff]  ;;  %v2735_v46 = vpack.c.bf16 %v1725_v42, %v1723_v51  ;;  %v1722_v58 = vld [vmem:[#allocation12 + $0x360] sm:$0xff] }
 0x25b   : > { %v1599_v7 = vmul.f32 %v1567_v56, %v3953_v52  ;;  %v1727_v56 = vld [vmem:[#allocation12 + $0x388] sm:$0xff] }
 0x25c   : > { %v2952_v50 = vpop.eup %2951  ;;  %v1602_v10 = vmul.f32 %v1570_v61, %v3961_v62 }
 0x25d   : > { %v2954_v39 = vpop.eup %2953  ;;  %v1571_v63 = vmul.f32 %v2952_v50, %v3958_v57  ;;  %1830 = vmatprep.mubr.f32.mxu0 %v1599_v7  ;;  %2710 = vmatpush1.bf16.msra.mxu0 %v2709_v37  ;;  %v2717_v57 = vpack.c.bf16 %v1704_v19, %v1702_v16  ;;  %v1729_v37 = vld [vmem:[#allocation12 + $0x398] sm:$0xff]  ;;  %v1728_v7 = vld [vmem:[#allocation12 + $0x390] sm:$0xff]  ;;  %v1735_v16 = vld [vmem:[#allocation12 + $0x3c8] sm:$0xff] }
 0x25e   : > { %v1574_v54 = vmul.f32 %v2954_v39, %v3965_v6  ;;  %1831 = vmatmul.mubr.f32.gmra.mrb[24].mxu0 %v1598_v32  ;;  %2712 = vmatprep.subr.bf16.mxu0 %v2711_v3  ;;  %v2719_v6 = vpack.c.bf16 %v1709_v0, %v1707_v2  ;;  %v1724_v32 = vld [vmem:[#allocation12 + $0x370] sm:$0xff]  ;;  %v2739_v36 = vpack.c.bf16 %v1729_v37, %v1727_v56  ;;  %v1733_v50 = vld [vmem:[#allocation12 + $0x3b8] sm:$0xff]  ;;  %v1734_v0 = vld [vmem:[#allocation12 + $0x3c0] sm:$0xff] }
 0x25f   : > { %v2956_v17 = vpop.eup %2955  ;;  %v1603_v52 = vmul.f32 %v1571_v63, %v3963_v5  ;;  %v2737_v3 = vpack.c.bf16 %v1724_v32, %v1722_v58  ;;  %v2741_v39 = vpack.c.bf16 %v1728_v7, %v1726_v59  ;;  %v2743_v63 = vpack.c.bf16 %v1733_v50, %v1731_v4  ;;  %v1737_v19 = vld [vmem:[#allocation12 + $0x3d8] sm:$0xff] }
 0x260   : > { %v1575_v62 = vmul.f32 %v2956_v17, %v3968_v9  ;;  %v1606_v20 = vmul.f32 %v1574_v54, %v3971_v11  ;;  %v2721_v11 = vpack.c.bf16 %v1708_v38, %v1706_v21  ;;  %v1732_v54 = vld [vmem:[#allocation12 + $0x3b0] sm:$0xff]  ;;  %v2747_v2 = vpack.c.bf16 %v1737_v19, %v1735_v16 }
 0x261   : > { %1836 = vmatprep.mubr.f32.mxu0 %v1603_v52  ;;  %2714 = vmatpush1.bf16.msra.mxu0 %v2713_v14  ;;  %v1730_v14 = vld [vmem:[#allocation12 + $0x3a0] sm:$0xff] }
 0x262   : > { %v1607_v30 = vmul.f32 %v1575_v62, %v3974_v1  ;;  %1837 = vmatmul.mubr.f32.gmra.mrb[26].mxu0 %v1602_v10  ;;  %2716 = vmatprep.subr.bf16.mxu0 %v2715_v15  ;;  %v2723_v1 = vpack.c.bf16 %v1713_v23, %v1711_v53  ;;  %v2745_v52 = vpack.c.bf16 %v1732_v54, %v1730_v14  ;;  %v1736_v62 = vld [vmem:[#allocation12 + $0x3d0] sm:$0xff] }
 0x263   : > { %v2958_v45 = vpop.eup %2957  ;;  %v2749_v21 = vpack.c.bf16 %v1736_v62, %v1734_v0  ;;  %v1740_v53 = vld [vmem:[#allocation12 + $0x3f0] sm:$0xff] }
 0x264   : > { %v2960_v5 = vpop.eup %2959  ;;  %v1578_v22 = vmul.f32 %v2958_v45, %v3977_v13  ;;  %1842 = vmatprep.mubr.f32.mxu0 %v1607_v30  ;;  %v2727_v13 = vpack.c.bf16 %v1717_v40, %v1715_v31  ;;  %v1741_v30 = vld [vmem:[#allocation12 + $0x3f8] sm:$0xff]  ;;  %v1738_v45 = vld [vmem:[#allocation12 + $0x3e0] sm:$0xff] }
 0x265   : > { %v1579_v9 = vmul.f32 %v2960_v5, %v3981_v48  ;;  %2718 = vmatpush1.bf16.msra.mxu0 %v2717_v57  ;;  %v1714_v48 = vld [vmem:[#allocation12 + $0x320] sm:$0xff]  ;;  %v1739_v57 = vld [vmem:[#allocation12 + $0x3e8] sm:$0xff] }
 0x266   : > { %v1610_v12 = vmul.f32 %v1578_v22, %v3985_v49  ;;  %1843 = vmatmul.mubr.f32.gmra.mrb[28].mxu0 %v1606_v20  ;;  %2720 = vmatprep.subr.bf16.mxu0 %v2719_v6  ;;  %v1719_v49 = vld [vmem:[#allocation12 + $0x348] sm:$0xff]  ;;  %v2729_v41 = vpack.c.bf16 %v1716_v33, %v1714_v48  ;;  %v2751_v38 = vpack.c.bf16 %v1741_v30, %v1739_v57 }
 0x267   : > { %v1611_v24 = vmul.f32 %v1579_v9, %v3988_v28  ;;  %v2731_v28 = vpack.c.bf16 %v1721_v35, %v1719_v49  ;;  %v2753_v22 = vpack.c.bf16 %v1740_v53, %v1738_v45 }
 0x269   : > { %1848 = vmatprep.mubr.f32.mxu0 %v1611_v24  ;;  %2722 = vmatpush1.bf16.msra.mxu0 %v2721_v11 }
 0x26a   : > { %1849 = vmatmul.mubr.f32.gmra.mrb[30].mxu0 %v1610_v12  ;;  %2724 = vmatprep.subr.bf16.mxu0 %v2723_v1 }
 0x26b   : > { %v4017_v18 = vpop.f32.mrb[16].mxu1 }
 0x26c   : > { %v4019_v26 = vpop.f32.mrb[17].mxu1  ;;  %v2323_v9 = vmul.f32 -1.442695, %v4017_v18 }
 0x26d   : > { %2726 = vmatpush1.bf16.msra.mxu0 %v2725_v25  ;;  %v2324_v1 = vmul.f32 -1.442695, %v4019_v26 }
 0x26e   : > { %2728 = vmatprep.subr.bf16.mxu0 %v2727_v13  ;;  %2961 = vpow2.f32 %v2323_v9 }
 0x26f   : > { %v4021_v47 = vpop.f32.mrb[18].mxu1  ;;  %2963 = vpow2.f32 %v2324_v1 }
 0x270   : > { %v4023_v55 = vpop.f32.mrb[19].mxu1  ;;  %v2327_v27 = vmul.f32 -1.442695, %v4021_v47 }
 0x271   : > { %2730 = vmatpush1.bf16.msra.mxu0 %v2729_v41  ;;  %v2328_v29 = vmul.f32 -1.442695, %v4023_v55 }
 0x272   : > { %2732 = vmatprep.subr.bf16.mxu0 %v2731_v28  ;;  %2965 = vpow2.f32 %v2327_v27 }
 0x273   : > { %v4025_v60 = vpop.f32.mrb[20].mxu1  ;;  %2967 = vpow2.f32 %v2328_v29 }
 0x274   : > { %v4027_v61 = vpop.f32.mrb[21].mxu1  ;;  %v2331_v24 = vmul.f32 -1.442695, %v4025_v60 }
 0x275   : > { %2734 = vmatpush1.bf16.msra.mxu0 %v2733_v34  ;;  %v2332_v31 = vmul.f32 -1.442695, %v4027_v61 }
 0x276   : > { %2736 = vmatprep.subr.bf16.mxu0 %v2735_v46  ;;  %2969 = vpow2.f32 %v2331_v24 }
 0x277   : > { %v4029_v8 = vpop.f32.mrb[22].mxu1  ;;  %2971 = vpow2.f32 %v2332_v31 }
 0x278   : > { %v4031_v10 = vpop.f32.mrb[23].mxu1  ;;  %v2335_v40 = vmul.f32 -1.442695, %v4029_v8  ;;  %v2962_v25 = vpop.eup %2961 }
 0x279   : > { %2738 = vmatpush1.bf16.msra.mxu0 %v2737_v3  ;;  %v2336_v13 = vmul.f32 -1.442695, %v4031_v10  ;;  %v2964_v48 = vpop.eup %2963  ;;  %v1456_v33 = vadd.f32 1.0, %v2962_v25 }
 0x27a   : > { %2740 = vmatprep.subr.bf16.mxu0 %v2739_v36  ;;  %2973 = vpow2.f32 %v2335_v40  ;;  %v1457_v28 = vadd.f32 1.0, %v2964_v48 }
 0x27b   : > { %v4033_v15 = vpop.f32.mrb[24].mxu1  ;;  %2975 = vpow2.f32 %v2336_v13 }
 0x27c   : > { %v4035_v17 = vpop.f32.mrb[25].mxu1  ;;  %v2966_v49 = vpop.eup %2965  ;;  %v2339_v35 = vmul.f32 -1.442695, %v4033_v15  ;;  %2977 = vrcp.f32 %v1456_v33 }
 0x27d   : > { %2742 = vmatpush1.bf16.msra.mxu0 %v2741_v39  ;;  %v2340_v41 = vmul.f32 -1.442695, %v4035_v17  ;;  %v2968_v43 = vpop.eup %2967  ;;  %v1460_v44 = vadd.f32 1.0, %v2966_v49 }
 0x27e   : > { %2744 = vmatprep.subr.bf16.mxu0 %v2743_v63  ;;  %2979 = vpow2.f32 %v2339_v35  ;;  %v1461_v46 = vadd.f32 1.0, %v2968_v43 }
 0x27f   : > { %v4037_v20 = vpop.f32.mrb[26].mxu1  ;;  %2981 = vpow2.f32 %v2340_v41 }
 0x280   : > { %v4039_v6 = vpop.f32.mrb[27].mxu1  ;;  %v2970_v51 = vpop.eup %2969  ;;  %v2343_v42 = vmul.f32 -1.442695, %v4037_v20  ;;  %2983 = vrcp.f32 %v1457_v28 }
 0x281   : > { %2746 = vmatpush1.bf16.msra.mxu0 %v2745_v52  ;;  %v2344_v34 = vmul.f32 -1.442695, %v4039_v6  ;;  %v2972_v58 = vpop.eup %2971  ;;  %2985 = vrcp.f32 %v1460_v44  ;;  %v1464_v32 = vadd.f32 1.0, %v2970_v51 }
 0x282   : > { %2748 = vmatprep.subr.bf16.mxu0 %v2747_v2  ;;  %2987 = vpow2.f32 %v2343_v42  ;;  %v1465_v36 = vadd.f32 1.0, %v2972_v58 }
 0x283   : > { %v4041_v23 = vpop.f32.mrb[28].mxu1  ;;  %2989 = vpow2.f32 %v2344_v34 }
 0x284   : > { %v4043_v5 = vpop.f32.mrb[29].mxu1  ;;  %v2974_v56 = vpop.eup %2973  ;;  %v2347_v37 = vmul.f32 -1.442695, %v4041_v23  ;;  %2991 = vrcp.f32 %v1461_v46 }
 0x285   : > { %2750 = vmatpush1.bf16.msra.mxu0 %v2749_v21  ;;  %v2348_v3 = vmul.f32 -1.442695, %v4043_v5  ;;  %v2976_v59 = vpop.eup %2975  ;;  %2993 = vrcp.f32 %v1464_v32  ;;  %v1468_v7 = vadd.f32 1.0, %v2974_v56 }
 0x286   : > { %2752 = vmatprep.subr.bf16.mxu0 %v2751_v38  ;;  %2995 = vpow2.f32 %v2347_v37  ;;  %v2978_v50 = vpop.eup %2977  ;;  %v1469_v14 = vadd.f32 1.0, %v2976_v59 }
 0x287   : > { %v4046_v11 = vpop.f32.mrb[30].mxu1  ;;  %2997 = vpow2.f32 %v2348_v3  ;;  %v1552_v0 = vmul.f32 %v2978_v50, %v4017_v18 }
 0x288   : > { %v4048_v12 = vpop.f32.mrb[31].mxu1  ;;  %v2351_v4 = vmul.f32 -1.442695, %v4046_v11  ;;  %v2980_v63 = vpop.eup %2979  ;;  %2999 = vrcp.f32 %v1465_v36 }
 0x289   : > { %2754 = vmatpush1.bf16.msra.mxu0 %v2753_v22  ;;  %v2352_v39 = vmul.f32 -1.442695, %v4048_v12  ;;  %v2982_v54 = vpop.eup %2981  ;;  %3001 = vrcp.f32 %v1468_v7  ;;  %v1472_v52 = vadd.f32 1.0, %v2980_v63 }
 0x28a   : > { %v2984_v16 = vpop.eup %2983  ;;  %3003 = vpow2.f32 %v2351_v4  ;;  %v1473_v62 = vadd.f32 1.0, %v2982_v54 }
 0x28b   : > { %v2986_v19 = vpop.eup %2985  ;;  %3005 = vpow2.f32 %v2352_v39  ;;  %v1553_v30 = vmul.f32 %v2984_v16, %v4019_v26 }
 0x28c   : > { %v2988_v2 = vpop.eup %2987  ;;  %3007 = vrcp.f32 %v1469_v14  ;;  %v1556_v29 = vmul.f32 %v2986_v19, %v4021_v47 }
 0x28d   : > { %v2990_v57 = vpop.eup %2989  ;;  %3009 = vrcp.f32 %v1472_v52  ;;  %v1476_v9 = vadd.f32 1.0, %v2988_v2 }
 0x28e   : > { %v2992_v38 = vpop.eup %2991  ;;  %3011 = vrcp.f32 %v1473_v62  ;;  %v1477_v24 = vadd.f32 1.0, %v2990_v57 }
 0x28f   : > { %v2994_v22 = vpop.eup %2993  ;;  %v1557_v18 = vmul.f32 %v2992_v38, %v4023_v55  ;;  %3013 = vrcp.f32 %v1476_v9 }
 0x290   : > { %v2996_v27 = vpop.eup %2995  ;;  %v1560_v41 = vmul.f32 %v2994_v22, %v4025_v60  ;;  %3015 = vrcp.f32 %v1477_v24 }
 0x291   : > { %v2998_v31 = vpop.eup %2997  ;;  %v1480_v33 = vadd.f32 1.0, %v2996_v27 }
 0x292   : > { %v3000_v25 = vpop.eup %2999  ;;  %v1481_v47 = vadd.f32 1.0, %v2998_v31 }
 0x293   : > { %v3002_v48 = vpop.eup %3001  ;;  %v1561_v43 = vmul.f32 %v3000_v25, %v4027_v61  ;;  %3017 = vrcp.f32 %v1480_v33 }
 0x294   : > { %v3004_v35 = vpop.eup %3003  ;;  %v1564_v58 = vmul.f32 %v3002_v48, %v4029_v8  ;;  %3019 = vrcp.f32 %v1481_v47 }
 0x295   : > { %v3006_v28 = vpop.eup %3005  ;;  %v1484_v34 = vadd.f32 1.0, %v3004_v35 }
 0x296   : > { %v3008_v55 = vpop.eup %3007  ;;  %v1485_v32 = vadd.f32 1.0, %v3006_v28 }
 0x297   : > { %v3010_v56 = vpop.eup %3009  ;;  %v1565_v60 = vmul.f32 %v3008_v55, %v4031_v10  ;;  %3021 = vrcp.f32 %v1484_v34 }
 0x298   : > { %v3012_v3 = vpop.eup %3011  ;;  %v1568_v7 = vmul.f32 %v3010_v56, %v4033_v15  ;;  %3023 = vrcp.f32 %v1485_v32 }
 0x299   : > { %v3014_v4 = vpop.eup %3013  ;;  %v1569_v50 = vmul.f32 %v3012_v3, %v4035_v17 }
 0x29a   : > { %v3016_v39 = vpop.eup %3015  ;;  %v1572_v54 = vmul.f32 %v3014_v4, %v4037_v20 }
 0x29b   : > { %v1573_v19 = vmul.f32 %v3016_v39, %v4039_v6 }
 0x29d   : > { %v3018_v16 = vpop.eup %3017 }
 0x29e   : > { %v3020_v2 = vpop.eup %3019  ;;  %v1576_v17 = vmul.f32 %v3018_v16, %v4041_v23 }
 0x2a1   : > { %v3022_v57 = vpop.eup %3021 }
 0x2a2   : > { %v3024_v38 = vpop.eup %3023 }
 0x2a3   : > { %v1581_v22 = vmul.f32 %v3024_v38, %v4048_v12 }
 0x2ab   : > { %v1311_v21 = vpop.f32.mrb[32].mxu1 }
 0x2ac   : > { %v1584_v45 = vmul.f32 %v1552_v0, %v1311_v21  ;;  %v1313_v53 = vpop.f32.mrb[33].mxu1 }
 0x2ad   : > { %v1585_v1 = vmul.f32 %v1553_v30, %v1313_v53  ;;  %v1577_v30 = vmul.f32 %v3020_v2, %v4043_v5  ;;  %v1580_v53 = vmul.f32 %v3022_v57, %v4046_v11 }
 0x2af   : > { %v1317_v40 = vpop.f32.mrb[34].mxu1  ;;  %1919 = vmatprep.mubr.f32.mxu0 %v1585_v1 }
 0x2b0   : > { %v1588_v26 = vmul.f32 %v1556_v29, %v1317_v40  ;;  %v1319_v13 = vpop.f32.mrb[35].mxu1  ;;  %1920 = vmatmul.mubr.f32.vlgmr.msra.gmra.mrb[16].mxu0 %v1584_v45 }
 0x2b1   : > { %v1589_v49 = vmul.f32 %v1557_v18, %v1319_v13 }
 0x2b3   : > { %v1323_v44 = vpop.f32.mrb[36].mxu1  ;;  %1925 = vmatprep.mubr.f32.mxu0 %v1589_v49 }
 0x2b4   : > { %v1592_v51 = vmul.f32 %v1560_v41, %v1323_v44  ;;  %v1325_v42 = vpop.f32.mrb[37].mxu1  ;;  %1926 = vmatmul.mubr.f32.gmra.mrb[18].mxu0 %v1588_v26 }
 0x2b5   : > { %v1593_v46 = vmul.f32 %v1561_v43, %v1325_v42 }
 0x2b7   : > { %v1329_v37 = vpop.f32.mrb[38].mxu1  ;;  %1931 = vmatprep.mubr.f32.mxu0 %v1593_v46 }
 0x2b8   : > { %v1596_v61 = vmul.f32 %v1564_v58, %v1329_v37  ;;  %v1331_v36 = vpop.f32.mrb[39].mxu1  ;;  %1932 = vmatmul.mubr.f32.gmra.mrb[20].mxu0 %v1592_v51 }
 0x2b9   : > { %v1597_v59 = vmul.f32 %v1565_v60, %v1331_v36 }
 0x2bb   : > { %v1335_v8 = vpop.f32.mrb[40].mxu1  ;;  %1937 = vmatprep.mubr.f32.mxu0 %v1597_v59 }
 0x2bc   : > { %v1600_v63 = vmul.f32 %v1568_v7, %v1335_v8  ;;  %v1337_v14 = vpop.f32.mrb[41].mxu1  ;;  %1938 = vmatmul.mubr.f32.gmra.mrb[22].mxu0 %v1596_v61 }
 0x2bd   : > { %v1601_v10 = vmul.f32 %v1569_v50, %v1337_v14 }
 0x2bf   : > { %v1341_v52 = vpop.f32.mrb[42].mxu1  ;;  %1943 = vmatprep.mubr.f32.mxu0 %v1601_v10 }
 0x2c0   : > { %v1604_v15 = vmul.f32 %v1572_v54, %v1341_v52  ;;  %v1343_v0 = vpop.f32.mrb[43].mxu1  ;;  %1944 = vmatmul.mubr.f32.gmra.mrb[24].mxu0 %v1600_v63 }
 0x2c1   : > { %v1605_v62 = vmul.f32 %v1573_v19, %v1343_v0 }
 0x2c3   : > { %v1347_v21 = vpop.f32.mrb[44].mxu1  ;;  %1949 = vmatprep.mubr.f32.mxu0 %v1605_v62 }
 0x2c4   : > { %v1608_v20 = vmul.f32 %v1576_v17, %v1347_v21  ;;  %v1349_v6 = vpop.f32.mrb[45].mxu1  ;;  %1950 = vmatmul.mubr.f32.gmra.mrb[26].mxu0 %v1604_v15 }
 0x2c5   : > { %v1609_v45 = vmul.f32 %v1577_v30, %v1349_v6 }
 0x2c7   : > { %v1353_v23 = vpop.f32.mrb[46].mxu1  ;;  %1955 = vmatprep.mubr.f32.mxu0 %v1609_v45 }
 0x2c8   : > { %v1612_v9 = vmul.f32 %v1580_v53, %v1353_v23  ;;  %v1355_v5 = vpop.f32.mrb[47].mxu1  ;;  %1956 = vmatmul.mubr.f32.gmra.mrb[28].mxu0 %v1608_v20 }
 0x2c9   : > { %v1613_v1 = vmul.f32 %v1581_v22, %v1355_v5 }
 0x2cb   : > { %1961 = vmatprep.mubr.f32.mxu0 %v1613_v1 }
 0x2cc   : > { %1962 = vmatmul.mubr.f32.gmra.mrb[30].mxu0 %v1612_v9 }
 0x2cd   : > { %3185 = shalt.err (!%p3182_p9)
}
 0x2ce   : > { %s3186_s30 = scalar_lea.hbm %s4087_s6, 2048  ;;  %s3190_s24 = scalar_lea.hbm %s4244_s20, 4096 }
 0x2cf   : > { %p3187_p0 = scmp.ne.s32.totalorder %s4087_s6, %s3186_s30  ;;  %p3191_p12 = scmp.lt.u32.totalorder %s4087_s6, %s4244_s20 }
 0x2d0   : > { %p3192_p1 = scmp.lt.u32.totalorder %s3190_s24, %s3186_s30  ;;  %p3194_p13 = scmp.lt.u32.totalorder %s3186_s30, %s4087_s6 }
 0x2d1   : > { %p3188_p10 = pnand %p3187_p0, %p3509_p3 }
 0x2d2   : > { %p3193_p6 = por %p3192_p1, %p3191_p12 }
 0x2d3   : > { %p3189_p8 = pneg %p3188_p10 }
 0x2d4   : > { %p3195_p4 = por %p3194_p13, %p3193_p6 }
 0x2d6   : > { %p3196_p2 = pnand %p3195_p4, %p3189_p8 }
 0x2d8   : > { %3199 = shalt.err (!%p3196_p2)
}
 0x2d9   : > { %s3311_s27 = smov 256   ;;  %s3312_s23 = smov 16  }
 0x2da   : > { %2788 = dma.vmem_to_hbm [thread:$0]  (%p3509_p3), %s4090_s2, 2048, %s4087_s6, %s2096_s9, %s3311_s27, %s3311_s27, %s3312_s23  }
 0x2db   : > { %s4120_s11 = scalar_lea.vmem [#allocation13], %s3613_s16  ;;  %s4245_s9 = sld [smem:[#allocation27_spill]] }
 0x2dc   : > { %s2110_s16 = sshll.u32 %s4120_s11, 4  ;;  %s2091_s19 = scalar_lea.sflag [#allocation6], %s3610_s13  ;;  %s4144_s16 = int_to_ptr.vmem [resolvable:$true] %s2110_s16 }
 0x2dd   : > { %s3200_s30 = scalar_lea.vmem %s4144_s16, 2048  ;;  %s3313_s12 = smov [#allocation13]  }
 0x2de   : > { %p3201_p11 = scmp.ne.s32.totalorder %s4144_s16, %s3200_s30  ;;  %s3204_s14 = sshll.u32 %s3313_s12, 4  ;;  %s3205_s14 = int_to_ptr.vmem [resolvable:$false] %s3204_s14 }
 0x2df   : > { %s3206_s22 = scalar_lea.vmem %s3205_s14, 4096  ;;  %p3207_p9 = scmp.lt.s32.totalorder %s4144_s16, %s3205_s14 }
 0x2e0   : > { %p3202_p5 = pnand %p3201_p11, %p3509_p3  ;;  %p3208_p0 = scmp.lt.s32.totalorder %s3206_s22, %s3200_s30 }
 0x2e1   : > { %s4142_s17 = scalar_lea.hbm %s4245_s9, %s2368_s21 }
 0x2e2   : > { %p3203_p7 = pneg %p3202_p5  ;;  %p3209_p10 = por %p3208_p0, %p3207_p9 }
 0x2e4   : > { %p3210_p8 = pnand %p3209_p10, %p3203_p7 }
 0x383   : > { %v1921_v11 = vpop.f32.mrb[16].mxu0 }
 0x384   : > { %v2058_v12 = vmul.f32 0.49497473, %v1921_v11  ;;  %v1923_v27 = vpop.f32.mrb[17].mxu0 }
 0x385   : > { %v2059_v29 = vmul.f32 0.49497473, %v1923_v27 }
 0x386   : > { %2074 = vst [vmem:[%s4120_s11] sm:$0xff] %v2058_v12 }
 0x387   : > { %2075 = vst [vmem:[%s4120_s11 + $0x8] sm:$0xff] %v2059_v29  ;;  %v1927_v24 = vpop.f32.mrb[18].mxu0 }
 0x388   : > { %v2060_v31 = vmul.f32 0.49497473, %v1927_v24  ;;  %v1929_v18 = vpop.f32.mrb[19].mxu0 }
 0x389   : > { %v2061_v40 = vmul.f32 0.49497473, %v1929_v18 }
 0x38a   : > { %2076 = vst [vmem:[%s4120_s11 + $0x10] sm:$0xff] %v2060_v31 }
 0x38b   : > { %2077 = vst [vmem:[%s4120_s11 + $0x18] sm:$0xff] %v2061_v40  ;;  %v1933_v25 = vpop.f32.mrb[20].mxu0 }
 0x38c   : > { %v2062_v26 = vmul.f32 0.49497473, %v1933_v25  ;;  %v1935_v13 = vpop.f32.mrb[21].mxu0 }
 0x38d   : > { %v2063_v48 = vmul.f32 0.49497473, %v1935_v13 }
 0x38e   : > { %2078 = vst [vmem:[%s4120_s11 + $0x20] sm:$0xff] %v2062_v26 }
 0x38f   : > { %2079 = vst [vmem:[%s4120_s11 + $0x28] sm:$0xff] %v2063_v48  ;;  %v1939_v33 = vpop.f32.mrb[22].mxu0 }
 0x390   : > { %v2064_v49 = vmul.f32 0.49497473, %v1939_v33  ;;  %v1941_v35 = vpop.f32.mrb[23].mxu0 }
 0x391   : > { %v2065_v41 = vmul.f32 0.49497473, %v1941_v35 }
 0x392   : > { %2080 = vst [vmem:[%s4120_s11 + $0x30] sm:$0xff] %v2064_v49 }
 0x393   : > { %2081 = vst [vmem:[%s4120_s11 + $0x38] sm:$0xff] %v2065_v41  ;;  %v1945_v47 = vpop.f32.mrb[24].mxu0 }
 0x394   : > { %v2066_v28 = vmul.f32 0.49497473, %v1945_v47  ;;  %v1947_v43 = vpop.f32.mrb[25].mxu0 }
 0x395   : > { %v2067_v44 = vmul.f32 0.49497473, %v1947_v43 }
 0x396   : > { %2082 = vst [vmem:[%s4120_s11 + $0x40] sm:$0xff] %v2066_v28 }
 0x397   : > { %2083 = vst [vmem:[%s4120_s11 + $0x48] sm:$0xff] %v2067_v44  ;;  %v1951_v55 = vpop.f32.mrb[26].mxu0 }
 0x398   : > { %v2068_v51 = vmul.f32 0.49497473, %v1951_v55  ;;  %v1953_v42 = vpop.f32.mrb[27].mxu0 }
 0x399   : > { %v2069_v34 = vmul.f32 0.49497473, %v1953_v42 }
 0x39a   : > { %2084 = vst [vmem:[%s4120_s11 + $0x50] sm:$0xff] %v2068_v51 }
 0x39b   : > { %2085 = vst [vmem:[%s4120_s11 + $0x58] sm:$0xff] %v2069_v34  ;;  %v1957_v46 = vpop.f32.mrb[28].mxu0 }
 0x39c   : > { %v2070_v58 = vmul.f32 0.49497473, %v1957_v46  ;;  %v1959_v32 = vpop.f32.mrb[29].mxu0 }
 0x39d   : > { %v2071_v56 = vmul.f32 0.49497473, %v1959_v32 }
 0x39e   : > { %2086 = vst [vmem:[%s4120_s11 + $0x60] sm:$0xff] %v2070_v58 }
 0x39f   : > { %2087 = vst [vmem:[%s4120_s11 + $0x68] sm:$0xff] %v2071_v56  ;;  %v1963_v60 = vpop.f32.mrb[30].mxu0 }
 0x3a0   : > { %v2072_v37 = vmul.f32 0.49497473, %v1963_v60  ;;  %v1965_v3 = vpop.f32.mrb[31].mxu0 }
 0x3a1   : > { %v2073_v61 = vmul.f32 0.49497473, %v1965_v3 }
 0x3a2   : > { %2088 = vst [vmem:[%s4120_s11 + $0x70] sm:$0xff] %v2072_v37 }
 0x3a3   : > { %2089 = vst [vmem:[%s4120_s11 + $0x78] sm:$0xff] %v2073_v61 }
 0x3a4   : > { %3213 = shalt.err (!%p3210_p8)
}
 0x3a5   : > { %s3214_s21 = scalar_lea.hbm %s4142_s17, 2048  ;;  %s3218_s7 = scalar_lea.hbm %s4245_s9, 4096 }
 0x3a6   : > { %p3215_p12 = scmp.ne.s32.totalorder %s4142_s17, %s3214_s21  ;;  %p3219_p13 = scmp.lt.u32.totalorder %s4142_s17, %s4245_s9 }
 0x3a7   : > { %p3220_p4 = scmp.lt.u32.totalorder %s3218_s7, %s3214_s21  ;;  %p3222_p11 = scmp.lt.u32.totalorder %s3214_s21, %s4142_s17 }
 0x3a8   : > { %p3216_p1 = pnand %p3215_p12, %p3509_p3 }
 0x3a9   : > { %p3221_p2 = por %p3220_p4, %p3219_p13 }
 0x3aa   : > { %p3217_p6 = pneg %p3216_p1 }
 0x3ab   : > { %p3223_p5 = por %p3222_p11, %p3221_p2 }
 0x3ad   : > { %p3224_p7 = pnand %p3223_p5, %p3217_p6 }
 0x3af   : > { %3227 = shalt.err (!%p3224_p7)
}
 0x3b0   : > { %2787 = dma.vmem_to_hbm [thread:$0]  (%p3509_p3), %s4144_s16, 2048, %s4142_s17, %s2091_s19, %s3311_s27, %s3311_s27, %s3312_s23  }
 0x3b1 PF: > { %s4246_s2 = sld [smem:[#allocation22_spill]]  ;;  %s4247_s30 = sld [smem:[#allocation25_spill]] }
 0x3b2   : > { %p4249_p0 = scmp.ge.s32.totalorder %s3298_s29, 2 }
 0x3b7   : > { %s2142_s12 = sand.u32 1, %s4246_s2   ;;  %p4248_p9 = scmp.ne.s32.totalorder %s4247_s30, 0 }
 0x3b8   : > { %s2143_s14 = scalar_lea.sflag [#allocation6], %s2142_s12 }
 0x3b9   : > { %p2809_p10 = pnand %p4249_p0, %p4248_p9 }
 0x3bb   : > { %3269 = dma.done.wait (!%p2809_p10), %s2143_s14, 2048  }
 0x3bc   : > { %3271 = vsyncadd (!%p2809_p10), %s2143_s14, 4294965248  ;;  %s2152_s18 = scalar_lea.sflag [#allocation15], %s2142_s12 }
 0x3bd   : > { %3273 = dma.done.wait (!%p2809_p10), %s2152_s18, 2048  }
 0x3be   : > { %3275 = vsyncadd (!%p2809_p10), %s2152_s18, 4294965248  ;;  %s31_s29 = sadd.s32 1, %s3298_s29   ;;  %s4250_s24 = smov %s3282_s25 }
 0x3bf   : > { %p28_p8 = scmp.ge.s32.totalorder %s31_s29, 4   ;;  %s4251_s25 = smov %s3286_s26 }
 0x3c0   : > { %s4252_s26 = smov %s3521_s10  ;;  %s4253_s27 = smov %s3294_s28 }
 0x3c1   : > { %s4254_s28 = smov %s4256_s15  ;;  %30 = sbr.rel (!%p28_p8) target bundleno = 15 (0xf), region = 150 }
 0x3c8   :  { %2157 = vsyncpa [#allocation5], 1 }
 0x3c9   :  { %2159 = vsyncpa [#allocation5 + $0x1], 1 }
 0x3ca   :  { %2160 = vsyncpa [#allocation8], 1 }
 0x3cb   :  { %2162 = vsyncpa [#allocation8 + $0x1], 1 }
 0x3cc   :  { %2163 = vsyncpa [#allocation11], 1 }
 0x3cd   :  { %2164 = vsyncpa [#allocation6], 1 }
 0x3ce   :  { %2166 = vsyncpa [#allocation6 + $0x1], 1 }
 0x3cf   :  { %2167 = vsyncpa [#allocation15], 1 }
 0x3d0   :  { %2169 = vsyncpa [#allocation15 + $0x1], 1 }

</bundles_post_ra>
